<compile_context>
chip_gen: v7x
topology: tpu7x:2x2x1
jax: 0.10.0
libtpu: 0.0.40
codegen_flags: <defaults>
</compile_context>

<pallas_src>
import numpy as np
import jax
import jax.numpy as jnp
from jax import lax
from jax.experimental import pallas as pl
from jax.experimental.pallas import tpu as pltpu


# ----------------------------------------------------------------------------
# Fused kernel: one grid step == one sample; conv layers + FC fully in VMEM.
# refs layout: (x, [S, W, b] * num_conv_layers, Wfc, bfc, out)
# ----------------------------------------------------------------------------
def _make_mapcnn_kernel(num_conv_layers, slope):
    def kernel(*refs):
        x_ref = refs[0]
        wfc_ref = refs[1 + 3 * num_conv_layers]
        bfc_ref = refs[2 + 3 * num_conv_layers]
        o_ref = refs[-1]

        # (H*W, Cin) activation, spatial-major / channel-minor (NHWC-flat).
        act = x_ref[0].astype(jnp.bfloat16)

        for l in range(num_conv_layers):
            s_ref = refs[1 + 3 * l]   # (k*k, Ho*Wo, Hin*Win) 0/1 selectors, bf16
            w_ref = refs[2 + 3 * l]   # (k*k, Cin, Cout)       bf16
            b_ref = refs[3 + 3 * l]   # (1, Cout)              f32
            p_out = s_ref.shape[1]
            c_out = w_ref.shape[2]
            acc = jnp.zeros((p_out, c_out), jnp.float32)
            for j in range(s_ref.shape[0]):          # k*k taps, unrolled
                # Gather the shifted/strided window for tap j (exact 0/1 select).
                xs = jnp.dot(s_ref[j], act, preferred_element_type=jnp.float32)
                acc = acc + jnp.dot(xs.astype(jnp.bfloat16), w_ref[j],
                                    preferred_element_type=jnp.float32)
            y = acc + b_ref[...]                      # f32 epilogue
            act = jnp.where(y > 0.0, y, slope * y).astype(jnp.bfloat16)

        # Fully connected: out = sum_p act[p, :] @ Wfc[p]  (avoids an in-kernel
        # (P,C)->(1,P*C) reshape; PyTorch's flatten order is baked into Wfc).
        out = jnp.zeros((1, o_ref.shape[-1]), jnp.float32)
        for p in range(act.shape[0]):
            out = out + jnp.dot(act[p:p + 1, :], wfc_ref[p],
                                preferred_element_type=jnp.float32)
        o_ref[0] = (out + bfc_ref[...]).astype(o_ref.dtype)

    return kernel


def map_cnn_forward(kparams, x):
    """x: (N, C, H, W) f32 (PyTorch NCHW) -> (N, out_dim) f32."""
    N, C, H, W = x.shape
    # Single cheap layout op per forward: NCHW -> (N, H*W, C).  Everything else
    # (patch gather, both convs, fc) happens inside one fused Pallas kernel.
    xf = jnp.transpose(x, (0, 2, 3, 1)).reshape(N, H * W, C)

    layers = kparams['layers']
    Wfc, bfc = kparams['fc']
    out_dim = Wfc.shape[-1]

    inputs = [xf]
    in_specs = [pl.BlockSpec((1, H * W, C), lambda n: (n, 0, 0))]
    flops = 0
    for (S, Wm, Bm) in layers:
        k2, p_out, p_in = S.shape
        c_in, c_out = Wm.shape[1], Wm.shape[2]
        flops += k2 * 2 * p_out * (p_in * c_in + c_in * c_out)
        inputs += [S, Wm, Bm]
        in_specs += [pl.BlockSpec(S.shape, lambda n: (0, 0, 0)),
                     pl.BlockSpec(Wm.shape, lambda n: (0, 0, 0)),
                     pl.BlockSpec(Bm.shape, lambda n: (0, 0))]
    p2, c2, _ = Wfc.shape
    flops += 2 * p2 * c2 * out_dim
    inputs += [Wfc, bfc]
    in_specs += [pl.BlockSpec(Wfc.shape, lambda n: (0, 0, 0)),
                 pl.BlockSpec(bfc.shape, lambda n: (0, 0))]

    bytes_accessed = sum(int(a.size) * a.dtype.itemsize for a in inputs)
    bytes_accessed += N * out_dim * 4

    out = pl.pallas_call(
        _make_mapcnn_kernel(len(layers), 0.2),
        out_shape=jax.ShapeDtypeStruct((N, 1, out_dim), jnp.float32),
        grid=(N,),
        in_specs=in_specs,
        out_specs=pl.BlockSpec((1, 1, out_dim), lambda n: (n, 0, 0)),
        compiler_params=pltpu.CompilerParams(
            dimension_semantics=("parallel",)),     # v7x: 2 TCs split the batch
        cost_estimate=pl.CostEstimate(flops=int(N * flops), transcendentals=0,
                                      bytes_accessed=int(bytes_accessed)),
    )(*inputs)
    return out.reshape(N, out_dim)


# ----------------------------------------------------------------------------
# Parameters: PyTorch-layout init + one-time kernel-layout preparation.
# ----------------------------------------------------------------------------
def init_map_cnn_params(key, cfg):
    """PyTorch-layout parameters (Conv2d OIHW weights, Linear (out, in))."""
    map_channels = cfg.get('map_channels', 3)
    patch_size = cfg.get('patch_size', [100, 100])
    hdim = cfg.get('hdim', [32, 32])
    kernels = cfg.get('kernels', [3, 3])
    strides = cfg.get('strides', [3, 3])
    out_dim = cfg.get('out_dim', 32)

    params = {'convs': [], 'kernels': list(kernels), 'strides': list(strides),
              'map_channels': map_channels, 'patch_size': list(patch_size)}
    c_in = map_channels
    h, w = patch_size
    for i, c_out in enumerate(hdim):
        k, s = kernels[i], strides[i]
        key, kw_key, kb_key = jax.random.split(key, 3)
        fan_in = c_in * k * k
        bound = 1.0 / float(np.sqrt(fan_in))
        Wc = jax.random.uniform(kw_key, (c_out, c_in, k, k), jnp.float32, -bound, bound)
        Bc = jax.random.uniform(kb_key, (c_out,), jnp.float32, -bound, bound)
        params['convs'].append((Wc, Bc))
        h = (h - k) // s + 1
        w = (w - k) // s + 1
        c_in = c_out

    flat = c_in * h * w
    key, fw_key, fb_key = jax.random.split(key, 3)
    bound = 1.0 / float(np.sqrt(flat))
    fcW = jax.random.uniform(fw_key, (out_dim, flat), jnp.float32, -bound, bound)
    fcB = jax.random.uniform(fb_key, (out_dim,), jnp.float32, -bound, bound)
    params['fc'] = (fcW, fcB)
    return params


def _make_tap_selectors(h, w, k, s):
    """0/1 selectors: S[kh*k+kw, ho*Wo+wo, (ho*s+kh)*w + (wo*s+kw)] = 1."""
    ho = (h - k) // s + 1
    wo = (w - k) // s + 1
    S = np.zeros((k * k, ho * wo, h * w), np.float32)
    q = np.arange(ho * wo)
    oh, ow = q // wo, q % wo
    for kh in range(k):
        for kw in range(k):
            src = (oh * s + kh) * w + (ow * s + kw)
            S[kh * k + kw, q, src] = 1.0
    return jnp.asarray(S, jnp.bfloat16), ho, wo


def prepare_kernel_params(params):
    """One-time: selectors + pre-transposed bf16 weights (hoisted out of forward)."""
    h, w = params['patch_size']
    c_in = params['map_channels']
    layers = []
    for (Wc, Bc), k, s in zip(params['convs'], params['kernels'], params['strides']):
        c_out = Wc.shape[0]
        S, ho, wo = _make_tap_selectors(h, w, k, s)
        # (Cout, Cin, kh, kw) -> (k*k, Cin, Cout), tap-major to match selectors.
        Wm = jnp.transpose(Wc, (2, 3, 1, 0)).reshape(k * k, c_in, c_out).astype(jnp.bfloat16)
        Bm = Bc.reshape(1, c_out).astype(jnp.float32)
        layers.append((S, Wm, Bm))
        h, w, c_in = ho, wo, c_out
    fcW, fcB = params['fc']
    out_dim = fcW.shape[0]
    p2 = h * w
    # PyTorch flatten order is (c, h, w); in-kernel activations are (h*w, c), so
    # bake the permutation into the fc weight: (out, C2*H2*W2) -> (H2*W2, C2, out).
    Wfc = fcW.reshape(out_dim, c_in, p2).transpose(2, 1, 0).astype(jnp.bfloat16)
    bfc = fcB.reshape(1, out_dim).astype(jnp.float32)
    return {'layers': layers, 'fc': (Wfc, bfc)}


# Pure-JAX f32 reference for a silent correctness check.
def map_cnn_reference(params, x):
    for (Wc, Bc), s in zip(params['convs'], params['strides']):
        y = lax.conv_general_dilated(
            x, Wc, window_strides=(s, s), padding='VALID',
            dimension_numbers=('NCHW', 'OIHW', 'NCHW'))
        y = y + Bc[None, :, None, None]
        x = jnp.where(y > 0, y, 0.2 * y)
    x = x.reshape(x.shape[0], -1)
    fcW, fcB = params['fc']
    return x @ fcW.T + fcB


if __name__ == "__main__":
    cfg = {
        'map_channels': 4,
        'patch_size': [16, 16],
        'hdim': [8, 16],
        'kernels': [3, 3],
        'strides': [2, 2],
        'out_dim': 32,
    }
    key = jax.random.PRNGKey(0)
    key, pkey, xkey = jax.random.split(key, 3)
    params = init_map_cnn_params(pkey, cfg)
    kparams = prepare_kernel_params(params)       # one-time, outside the forward

    x = jax.random.normal(xkey, (2, 4, 16, 16), jnp.float32)   # NCHW

    forward = jax.jit(map_cnn_forward)
    out = jax.block_until_ready(forward(kparams, x))
    assert out.shape == (2, 32), out.shape

    # Silent correctness check vs. an f32 pure-JAX reference.  The kernel uses
    # bf16 MXU inputs with f32 accumulation, so the tolerance is relaxed.
    ref = jax.block_until_ready(map_cnn_reference(params, x))
    max_err = float(jnp.max(jnp.abs(out - ref)))
    assert jnp.allclose(out, ref, atol=5e-2, rtol=5e-2), max_err

    print("KERNEL_OK")
</pallas_src>

<mosaic_0001>
module attributes {stable_mosaic.version = 11 : i64} {
  func.func @kernel(%arg0: i32, %arg1: memref<1x256x4xf32, #tpu.memory_space<vmem>>, %arg2: memref<9x49x256xbf16, #tpu.memory_space<vmem>>, %arg3: memref<9x4x8xbf16, #tpu.memory_space<vmem>>, %arg4: memref<1x8xf32, #tpu.memory_space<vmem>>, %arg5: memref<9x9x49xbf16, #tpu.memory_space<vmem>>, %arg6: memref<9x8x16xbf16, #tpu.memory_space<vmem>>, %arg7: memref<1x16xf32, #tpu.memory_space<vmem>>, %arg8: memref<9x16x32xbf16, #tpu.memory_space<vmem>>, %arg9: memref<1x32xf32, #tpu.memory_space<vmem>>, %arg10: memref<1x1x32xf32, #tpu.memory_space<vmem>>) attributes {dimension_semantics = [#tpu.dimension_semantics<parallel>], iteration_bounds = array<i64: 2>, scalar_prefetch = 0 : i64, scratch_operands = 0 : i64, tpu.core_type = #tpu.core_type<tc>, window_params = [{transform_indices = @transform_0, window_bounds = array<i64: 1, 256, 4>}, {pipeline_mode = #tpu.pipeline_mode<synchronous>, transform_indices = @transform_1, window_bounds = array<i64: 9, 49, 256>}, {pipeline_mode = #tpu.pipeline_mode<synchronous>, transform_indices = @transform_2, window_bounds = array<i64: 9, 4, 8>}, {pipeline_mode = #tpu.pipeline_mode<synchronous>, transform_indices = @transform_3, window_bounds = array<i64: 1, 8>}, {pipeline_mode = #tpu.pipeline_mode<synchronous>, transform_indices = @transform_4, window_bounds = array<i64: 9, 9, 49>}, {pipeline_mode = #tpu.pipeline_mode<synchronous>, transform_indices = @transform_5, window_bounds = array<i64: 9, 8, 16>}, {pipeline_mode = #tpu.pipeline_mode<synchronous>, transform_indices = @transform_6, window_bounds = array<i64: 1, 16>}, {pipeline_mode = #tpu.pipeline_mode<synchronous>, transform_indices = @transform_7, window_bounds = array<i64: 9, 16, 32>}, {pipeline_mode = #tpu.pipeline_mode<synchronous>, transform_indices = @transform_8, window_bounds = array<i64: 1, 32>}, {transform_indices = @transform_9, window_bounds = array<i64: 1, 1, 32>}]} {
    %c0 = arith.constant 0 : index
    %c0_0 = arith.constant 0 : index
    %c0_1 = arith.constant 0 : index
    %0 = vector.load %arg1[%c0, %c0_0, %c0_1] : memref<1x256x4xf32, #tpu.memory_space<vmem>>, vector<1x256x4xf32>
    %1 = vector.shape_cast %0 : vector<1x256x4xf32> to vector<256x4xf32>
    %2 = arith.truncf %1 : vector<256x4xf32> to vector<256x4xbf16>
    %cst = arith.constant 0.000000e+00 : f32
    %3 = vector.broadcast %cst : f32 to vector<49x8xf32>
    %c0_2 = arith.constant 0 : index
    %c0_3 = arith.constant 0 : index
    %c0_4 = arith.constant 0 : index
    %4 = vector.load %arg2[%c0_2, %c0_3, %c0_4] : memref<9x49x256xbf16, #tpu.memory_space<vmem>>, vector<1x49x256xbf16>
    %5 = vector.shape_cast %4 : vector<1x49x256xbf16> to vector<49x256xbf16>
    %cst_5 = arith.constant dense<0.000000e+00> : vector<49x4xf32>
    %6 = tpu.matmul %5, %2, %cst_5 {dimension_numbers = #tpu.dot_dimension_numbers<[1], [0], [0], [1], [0, 0, 1, 1], [], []>} : vector<49x256xbf16>, vector<256x4xbf16>, vector<49x4xf32> -> vector<49x4xf32>
    %7 = arith.truncf %6 : vector<49x4xf32> to vector<49x4xbf16>
    %c0_6 = arith.constant 0 : index
    %c0_7 = arith.constant 0 : index
    %c0_8 = arith.constant 0 : index
    %8 = vector.load %arg3[%c0_6, %c0_7, %c0_8] : memref<9x4x8xbf16, #tpu.memory_space<vmem>>, vector<1x4x8xbf16>
    %9 = vector.shape_cast %8 : vector<1x4x8xbf16> to vector<4x8xbf16>
    %cst_9 = arith.constant dense<0.000000e+00> : vector<49x8xf32>
    %10 = tpu.matmul %7, %9, %cst_9 {dimension_numbers = #tpu.dot_dimension_numbers<[1], [0], [0], [1], [0, 0, 1, 1], [], []>} : vector<49x4xbf16>, vector<4x8xbf16>, vector<49x8xf32> -> vector<49x8xf32>
    %11 = arith.addf %3, %10 : vector<49x8xf32>
    %c1 = arith.constant 1 : index
    %c0_10 = arith.constant 0 : index
    %c0_11 = arith.constant 0 : index
    %12 = vector.load %arg2[%c1, %c0_10, %c0_11] : memref<9x49x256xbf16, #tpu.memory_space<vmem>>, vector<1x49x256xbf16>
    %13 = vector.shape_cast %12 : vector<1x49x256xbf16> to vector<49x256xbf16>
    %cst_12 = arith.constant dense<0.000000e+00> : vector<49x4xf32>
    %14 = tpu.matmul %13, %2, %cst_12 {dimension_numbers = #tpu.dot_dimension_numbers<[1], [0], [0], [1], [0, 0, 1, 1], [], []>} : vector<49x256xbf16>, vector<256x4xbf16>, vector<49x4xf32> -> vector<49x4xf32>
    %15 = arith.truncf %14 : vector<49x4xf32> to vector<49x4xbf16>
    %c1_13 = arith.constant 1 : index
    %c0_14 = arith.constant 0 : index
    %c0_15 = arith.constant 0 : index
    %16 = vector.load %arg3[%c1_13, %c0_14, %c0_15] : memref<9x4x8xbf16, #tpu.memory_space<vmem>>, vector<1x4x8xbf16>
    %17 = vector.shape_cast %16 : vector<1x4x8xbf16> to vector<4x8xbf16>
    %cst_16 = arith.constant dense<0.000000e+00> : vector<49x8xf32>
    %18 = tpu.matmul %15, %17, %cst_16 {dimension_numbers = #tpu.dot_dimension_numbers<[1], [0], [0], [1], [0, 0, 1, 1], [], []>} : vector<49x4xbf16>, vector<4x8xbf16>, vector<49x8xf32> -> vector<49x8xf32>
    %19 = arith.addf %11, %18 : vector<49x8xf32>
    %c2 = arith.constant 2 : index
    %c0_17 = arith.constant 0 : index
    %c0_18 = arith.constant 0 : index
    %20 = vector.load %arg2[%c2, %c0_17, %c0_18] : memref<9x49x256xbf16, #tpu.memory_space<vmem>>, vector<1x49x256xbf16>
    %21 = vector.shape_cast %20 : vector<1x49x256xbf16> to vector<49x256xbf16>
    %cst_19 = arith.constant dense<0.000000e+00> : vector<49x4xf32>
    %22 = tpu.matmul %21, %2, %cst_19 {dimension_numbers = #tpu.dot_dimension_numbers<[1], [0], [0], [1], [0, 0, 1, 1], [], []>} : vector<49x256xbf16>, vector<256x4xbf16>, vector<49x4xf32> -> vector<49x4xf32>
    %23 = arith.truncf %22 : vector<49x4xf32> to vector<49x4xbf16>
    %c2_20 = arith.constant 2 : index
    %c0_21 = arith.constant 0 : index
    %c0_22 = arith.constant 0 : index
    %24 = vector.load %arg3[%c2_20, %c0_21, %c0_22] : memref<9x4x8xbf16, #tpu.memory_space<vmem>>, vector<1x4x8xbf16>
    %25 = vector.shape_cast %24 : vector<1x4x8xbf16> to vector<4x8xbf16>
    %cst_23 = arith.constant dense<0.000000e+00> : vector<49x8xf32>
    %26 = tpu.matmul %23, %25, %cst_23 {dimension_numbers = #tpu.dot_dimension_numbers<[1], [0], [0], [1], [0, 0, 1, 1], [], []>} : vector<49x4xbf16>, vector<4x8xbf16>, vector<49x8xf32> -> vector<49x8xf32>
    %27 = arith.addf %19, %26 : vector<49x8xf32>
    %c3 = arith.constant 3 : index
    %c0_24 = arith.constant 0 : index
    %c0_25 = arith.constant 0 : index
    %28 = vector.load %arg2[%c3, %c0_24, %c0_25] : memref<9x49x256xbf16, #tpu.memory_space<vmem>>, vector<1x49x256xbf16>
    %29 = vector.shape_cast %28 : vector<1x49x256xbf16> to vector<49x256xbf16>
    %cst_26 = arith.constant dense<0.000000e+00> : vector<49x4xf32>
    %30 = tpu.matmul %29, %2, %cst_26 {dimension_numbers = #tpu.dot_dimension_numbers<[1], [0], [0], [1], [0, 0, 1, 1], [], []>} : vector<49x256xbf16>, vector<256x4xbf16>, vector<49x4xf32> -> vector<49x4xf32>
    %31 = arith.truncf %30 : vector<49x4xf32> to vector<49x4xbf16>
    %c3_27 = arith.constant 3 : index
    %c0_28 = arith.constant 0 : index
    %c0_29 = arith.constant 0 : index
    %32 = vector.load %arg3[%c3_27, %c0_28, %c0_29] : memref<9x4x8xbf16, #tpu.memory_space<vmem>>, vector<1x4x8xbf16>
    %33 = vector.shape_cast %32 : vector<1x4x8xbf16> to vector<4x8xbf16>
    %cst_30 = arith.constant dense<0.000000e+00> : vector<49x8xf32>
    %34 = tpu.matmul %31, %33, %cst_30 {dimension_numbers = #tpu.dot_dimension_numbers<[1], [0], [0], [1], [0, 0, 1, 1], [], []>} : vector<49x4xbf16>, vector<4x8xbf16>, vector<49x8xf32> -> vector<49x8xf32>
    %35 = arith.addf %27, %34 : vector<49x8xf32>
    %c4 = arith.constant 4 : index
    %c0_31 = arith.constant 0 : index
    %c0_32 = arith.constant 0 : index
    %36 = vector.load %arg2[%c4, %c0_31, %c0_32] : memref<9x49x256xbf16, #tpu.memory_space<vmem>>, vector<1x49x256xbf16>
    %37 = vector.shape_cast %36 : vector<1x49x256xbf16> to vector<49x256xbf16>
    %cst_33 = arith.constant dense<0.000000e+00> : vector<49x4xf32>
    %38 = tpu.matmul %37, %2, %cst_33 {dimension_numbers = #tpu.dot_dimension_numbers<[1], [0], [0], [1], [0, 0, 1, 1], [], []>} : vector<49x256xbf16>, vector<256x4xbf16>, vector<49x4xf32> -> vector<49x4xf32>
    %39 = arith.truncf %38 : vector<49x4xf32> to vector<49x4xbf16>
    %c4_34 = arith.constant 4 : index
    %c0_35 = arith.constant 0 : index
    %c0_36 = arith.constant 0 : index
    %40 = vector.load %arg3[%c4_34, %c0_35, %c0_36] : memref<9x4x8xbf16, #tpu.memory_space<vmem>>, vector<1x4x8xbf16>
    %41 = vector.shape_cast %40 : vector<1x4x8xbf16> to vector<4x8xbf16>
    %cst_37 = arith.constant dense<0.000000e+00> : vector<49x8xf32>
    %42 = tpu.matmul %39, %41, %cst_37 {dimension_numbers = #tpu.dot_dimension_numbers<[1], [0], [0], [1], [0, 0, 1, 1], [], []>} : vector<49x4xbf16>, vector<4x8xbf16>, vector<49x8xf32> -> vector<49x8xf32>
    %43 = arith.addf %35, %42 : vector<49x8xf32>
    %c5 = arith.constant 5 : index
    %c0_38 = arith.constant 0 : index
    %c0_39 = arith.constant 0 : index
    %44 = vector.load %arg2[%c5, %c0_38, %c0_39] : memref<9x49x256xbf16, #tpu.memory_space<vmem>>, vector<1x49x256xbf16>
    %45 = vector.shape_cast %44 : vector<1x49x256xbf16> to vector<49x256xbf16>
    %cst_40 = arith.constant dense<0.000000e+00> : vector<49x4xf32>
    %46 = tpu.matmul %45, %2, %cst_40 {dimension_numbers = #tpu.dot_dimension_numbers<[1], [0], [0], [1], [0, 0, 1, 1], [], []>} : vector<49x256xbf16>, vector<256x4xbf16>, vector<49x4xf32> -> vector<49x4xf32>
    %47 = arith.truncf %46 : vector<49x4xf32> to vector<49x4xbf16>
    %c5_41 = arith.constant 5 : index
    %c0_42 = arith.constant 0 : index
    %c0_43 = arith.constant 0 : index
    %48 = vector.load %arg3[%c5_41, %c0_42, %c0_43] : memref<9x4x8xbf16, #tpu.memory_space<vmem>>, vector<1x4x8xbf16>
    %49 = vector.shape_cast %48 : vector<1x4x8xbf16> to vector<4x8xbf16>
    %cst_44 = arith.constant dense<0.000000e+00> : vector<49x8xf32>
    %50 = tpu.matmul %47, %49, %cst_44 {dimension_numbers = #tpu.dot_dimension_numbers<[1], [0], [0], [1], [0, 0, 1, 1], [], []>} : vector<49x4xbf16>, vector<4x8xbf16>, vector<49x8xf32> -> vector<49x8xf32>
    %51 = arith.addf %43, %50 : vector<49x8xf32>
    %c6 = arith.constant 6 : index
    %c0_45 = arith.constant 0 : index
    %c0_46 = arith.constant 0 : index
    %52 = vector.load %arg2[%c6, %c0_45, %c0_46] : memref<9x49x256xbf16, #tpu.memory_space<vmem>>, vector<1x49x256xbf16>
    %53 = vector.shape_cast %52 : vector<1x49x256xbf16> to vector<49x256xbf16>
    %cst_47 = arith.constant dense<0.000000e+00> : vector<49x4xf32>
    %54 = tpu.matmul %53, %2, %cst_47 {dimension_numbers = #tpu.dot_dimension_numbers<[1], [0], [0], [1], [0, 0, 1, 1], [], []>} : vector<49x256xbf16>, vector<256x4xbf16>, vector<49x4xf32> -> vector<49x4xf32>
    %55 = arith.truncf %54 : vector<49x4xf32> to vector<49x4xbf16>
    %c6_48 = arith.constant 6 : index
    %c0_49 = arith.constant 0 : index
    %c0_50 = arith.constant 0 : index
    %56 = vector.load %arg3[%c6_48, %c0_49, %c0_50] : memref<9x4x8xbf16, #tpu.memory_space<vmem>>, vector<1x4x8xbf16>
    %57 = vector.shape_cast %56 : vector<1x4x8xbf16> to vector<4x8xbf16>
    %cst_51 = arith.constant dense<0.000000e+00> : vector<49x8xf32>
    %58 = tpu.matmul %55, %57, %cst_51 {dimension_numbers = #tpu.dot_dimension_numbers<[1], [0], [0], [1], [0, 0, 1, 1], [], []>} : vector<49x4xbf16>, vector<4x8xbf16>, vector<49x8xf32> -> vector<49x8xf32>
    %59 = arith.addf %51, %58 : vector<49x8xf32>
    %c7 = arith.constant 7 : index
    %c0_52 = arith.constant 0 : index
    %c0_53 = arith.constant 0 : index
    %60 = vector.load %arg2[%c7, %c0_52, %c0_53] : memref<9x49x256xbf16, #tpu.memory_space<vmem>>, vector<1x49x256xbf16>
    %61 = vector.shape_cast %60 : vector<1x49x256xbf16> to vector<49x256xbf16>
    %cst_54 = arith.constant dense<0.000000e+00> : vector<49x4xf32>
    %62 = tpu.matmul %61, %2, %cst_54 {dimension_numbers = #tpu.dot_dimension_numbers<[1], [0], [0], [1], [0, 0, 1, 1], [], []>} : vector<49x256xbf16>, vector<256x4xbf16>, vector<49x4xf32> -> vector<49x4xf32>
    %63 = arith.truncf %62 : vector<49x4xf32> to vector<49x4xbf16>
    %c7_55 = arith.constant 7 : index
    %c0_56 = arith.constant 0 : index
    %c0_57 = arith.constant 0 : index
    %64 = vector.load %arg3[%c7_55, %c0_56, %c0_57] : memref<9x4x8xbf16, #tpu.memory_space<vmem>>, vector<1x4x8xbf16>
    %65 = vector.shape_cast %64 : vector<1x4x8xbf16> to vector<4x8xbf16>
    %cst_58 = arith.constant dense<0.000000e+00> : vector<49x8xf32>
    %66 = tpu.matmul %63, %65, %cst_58 {dimension_numbers = #tpu.dot_dimension_numbers<[1], [0], [0], [1], [0, 0, 1, 1], [], []>} : vector<49x4xbf16>, vector<4x8xbf16>, vector<49x8xf32> -> vector<49x8xf32>
    %67 = arith.addf %59, %66 : vector<49x8xf32>
    %c8 = arith.constant 8 : index
    %c0_59 = arith.constant 0 : index
    %c0_60 = arith.constant 0 : index
    %68 = vector.load %arg2[%c8, %c0_59, %c0_60] : memref<9x49x256xbf16, #tpu.memory_space<vmem>>, vector<1x49x256xbf16>
    %69 = vector.shape_cast %68 : vector<1x49x256xbf16> to vector<49x256xbf16>
    %cst_61 = arith.constant dense<0.000000e+00> : vector<49x4xf32>
    %70 = tpu.matmul %69, %2, %cst_61 {dimension_numbers = #tpu.dot_dimension_numbers<[1], [0], [0], [1], [0, 0, 1, 1], [], []>} : vector<49x256xbf16>, vector<256x4xbf16>, vector<49x4xf32> -> vector<49x4xf32>
    %71 = arith.truncf %70 : vector<49x4xf32> to vector<49x4xbf16>
    %c8_62 = arith.constant 8 : index
    %c0_63 = arith.constant 0 : index
    %c0_64 = arith.constant 0 : index
    %72 = vector.load %arg3[%c8_62, %c0_63, %c0_64] : memref<9x4x8xbf16, #tpu.memory_space<vmem>>, vector<1x4x8xbf16>
    %73 = vector.shape_cast %72 : vector<1x4x8xbf16> to vector<4x8xbf16>
    %cst_65 = arith.constant dense<0.000000e+00> : vector<49x8xf32>
    %74 = tpu.matmul %71, %73, %cst_65 {dimension_numbers = #tpu.dot_dimension_numbers<[1], [0], [0], [1], [0, 0, 1, 1], [], []>} : vector<49x4xbf16>, vector<4x8xbf16>, vector<49x8xf32> -> vector<49x8xf32>
    %75 = arith.addf %67, %74 : vector<49x8xf32>
    %c0_66 = arith.constant 0 : index
    %c0_67 = arith.constant 0 : index
    %76 = vector.load %arg4[%c0_66, %c0_67] : memref<1x8xf32, #tpu.memory_space<vmem>>, vector<1x8xf32>
    %77 = vector.broadcast %76 : vector<1x8xf32> to vector<49x8xf32>
    %78 = arith.addf %75, %77 : vector<49x8xf32>
    %cst_68 = arith.constant 0.000000e+00 : f32
    %79 = vector.broadcast %cst_68 : f32 to vector<49x8xf32>
    %80 = arith.cmpf ogt, %78, %79 : vector<49x8xf32>
    %cst_69 = arith.constant 2.000000e-01 : f32
    %81 = vector.broadcast %cst_69 : f32 to vector<49x8xf32>
    %82 = arith.mulf %81, %78 : vector<49x8xf32>
    %83 = arith.select %80, %78, %82 : vector<49x8xi1>, vector<49x8xf32>
    %84 = arith.truncf %83 : vector<49x8xf32> to vector<49x8xbf16>
    %cst_70 = arith.constant 0.000000e+00 : f32
    %85 = vector.broadcast %cst_70 : f32 to vector<9x16xf32>
    %c0_71 = arith.constant 0 : index
    %c0_72 = arith.constant 0 : index
    %c0_73 = arith.constant 0 : index
    %86 = vector.load %arg5[%c0_71, %c0_72, %c0_73] : memref<9x9x49xbf16, #tpu.memory_space<vmem>>, vector<1x9x49xbf16>
    %87 = vector.shape_cast %86 : vector<1x9x49xbf16> to vector<9x49xbf16>
    %cst_74 = arith.constant dense<0.000000e+00> : vector<9x8xf32>
    %88 = tpu.matmul %87, %84, %cst_74 {dimension_numbers = #tpu.dot_dimension_numbers<[1], [0], [0], [1], [0, 0, 1, 1], [], []>} : vector<9x49xbf16>, vector<49x8xbf16>, vector<9x8xf32> -> vector<9x8xf32>
    %89 = arith.truncf %88 : vector<9x8xf32> to vector<9x8xbf16>
    %c0_75 = arith.constant 0 : index
    %c0_76 = arith.constant 0 : index
    %c0_77 = arith.constant 0 : index
    %90 = vector.load %arg6[%c0_75, %c0_76, %c0_77] : memref<9x8x16xbf16, #tpu.memory_space<vmem>>, vector<1x8x16xbf16>
    %91 = vector.shape_cast %90 : vector<1x8x16xbf16> to vector<8x16xbf16>
    %cst_78 = arith.constant dense<0.000000e+00> : vector<9x16xf32>
    %92 = tpu.matmul %89, %91, %cst_78 {dimension_numbers = #tpu.dot_dimension_numbers<[1], [0], [0], [1], [0, 0, 1, 1], [], []>} : vector<9x8xbf16>, vector<8x16xbf16>, vector<9x16xf32> -> vector<9x16xf32>
    %93 = arith.addf %85, %92 : vector<9x16xf32>
    %c1_79 = arith.constant 1 : index
    %c0_80 = arith.constant 0 : index
    %c0_81 = arith.constant 0 : index
    %94 = vector.load %arg5[%c1_79, %c0_80, %c0_81] : memref<9x9x49xbf16, #tpu.memory_space<vmem>>, vector<1x9x49xbf16>
    %95 = vector.shape_cast %94 : vector<1x9x49xbf16> to vector<9x49xbf16>
    %cst_82 = arith.constant dense<0.000000e+00> : vector<9x8xf32>
    %96 = tpu.matmul %95, %84, %cst_82 {dimension_numbers = #tpu.dot_dimension_numbers<[1], [0], [0], [1], [0, 0, 1, 1], [], []>} : vector<9x49xbf16>, vector<49x8xbf16>, vector<9x8xf32> -> vector<9x8xf32>
    %97 = arith.truncf %96 : vector<9x8xf32> to vector<9x8xbf16>
    %c1_83 = arith.constant 1 : index
    %c0_84 = arith.constant 0 : index
    %c0_85 = arith.constant 0 : index
    %98 = vector.load %arg6[%c1_83, %c0_84, %c0_85] : memref<9x8x16xbf16, #tpu.memory_space<vmem>>, vector<1x8x16xbf16>
    %99 = vector.shape_cast %98 : vector<1x8x16xbf16> to vector<8x16xbf16>
    %cst_86 = arith.constant dense<0.000000e+00> : vector<9x16xf32>
    %100 = tpu.matmul %97, %99, %cst_86 {dimension_numbers = #tpu.dot_dimension_numbers<[1], [0], [0], [1], [0, 0, 1, 1], [], []>} : vector<9x8xbf16>, vector<8x16xbf16>, vector<9x16xf32> -> vector<9x16xf32>
    %101 = arith.addf %93, %100 : vector<9x16xf32>
    %c2_87 = arith.constant 2 : index
    %c0_88 = arith.constant 0 : index
    %c0_89 = arith.constant 0 : index
    %102 = vector.load %arg5[%c2_87, %c0_88, %c0_89] : memref<9x9x49xbf16, #tpu.memory_space<vmem>>, vector<1x9x49xbf16>
    %103 = vector.shape_cast %102 : vector<1x9x49xbf16> to vector<9x49xbf16>
    %cst_90 = arith.constant dense<0.000000e+00> : vector<9x8xf32>
    %104 = tpu.matmul %103, %84, %cst_90 {dimension_numbers = #tpu.dot_dimension_numbers<[1], [0], [0], [1], [0, 0, 1, 1], [], []>} : vector<9x49xbf16>, vector<49x8xbf16>, vector<9x8xf32> -> vector<9x8xf32>
    %105 = arith.truncf %104 : vector<9x8xf32> to vector<9x8xbf16>
    %c2_91 = arith.constant 2 : index
    %c0_92 = arith.constant 0 : index
    %c0_93 = arith.constant 0 : index
    %106 = vector.load %arg6[%c2_91, %c0_92, %c0_93] : memref<9x8x16xbf16, #tpu.memory_space<vmem>>, vector<1x8x16xbf16>
    %107 = vector.shape_cast %106 : vector<1x8x16xbf16> to vector<8x16xbf16>
    %cst_94 = arith.constant dense<0.000000e+00> : vector<9x16xf32>
    %108 = tpu.matmul %105, %107, %cst_94 {dimension_numbers = #tpu.dot_dimension_numbers<[1], [0], [0], [1], [0, 0, 1, 1], [], []>} : vector<9x8xbf16>, vector<8x16xbf16>, vector<9x16xf32> -> vector<9x16xf32>
    %109 = arith.addf %101, %108 : vector<9x16xf32>
    %c3_95 = arith.constant 3 : index
    %c0_96 = arith.constant 0 : index
    %c0_97 = arith.constant 0 : index
    %110 = vector.load %arg5[%c3_95, %c0_96, %c0_97] : memref<9x9x49xbf16, #tpu.memory_space<vmem>>, vector<1x9x49xbf16>
    %111 = vector.shape_cast %110 : vector<1x9x49xbf16> to vector<9x49xbf16>
    %cst_98 = arith.constant dense<0.000000e+00> : vector<9x8xf32>
    %112 = tpu.matmul %111, %84, %cst_98 {dimension_numbers = #tpu.dot_dimension_numbers<[1], [0], [0], [1], [0, 0, 1, 1], [], []>} : vector<9x49xbf16>, vector<49x8xbf16>, vector<9x8xf32> -> vector<9x8xf32>
    %113 = arith.truncf %112 : vector<9x8xf32> to vector<9x8xbf16>
    %c3_99 = arith.constant 3 : index
    %c0_100 = arith.constant 0 : index
    %c0_101 = arith.constant 0 : index
    %114 = vector.load %arg6[%c3_99, %c0_100, %c0_101] : memref<9x8x16xbf16, #tpu.memory_space<vmem>>, vector<1x8x16xbf16>
    %115 = vector.shape_cast %114 : vector<1x8x16xbf16> to vector<8x16xbf16>
    %cst_102 = arith.constant dense<0.000000e+00> : vector<9x16xf32>
    %116 = tpu.matmul %113, %115, %cst_102 {dimension_numbers = #tpu.dot_dimension_numbers<[1], [0], [0], [1], [0, 0, 1, 1], [], []>} : vector<9x8xbf16>, vector<8x16xbf16>, vector<9x16xf32> -> vector<9x16xf32>
    %117 = arith.addf %109, %116 : vector<9x16xf32>
    %c4_103 = arith.constant 4 : index
    %c0_104 = arith.constant 0 : index
    %c0_105 = arith.constant 0 : index
    %118 = vector.load %arg5[%c4_103, %c0_104, %c0_105] : memref<9x9x49xbf16, #tpu.memory_space<vmem>>, vector<1x9x49xbf16>
    %119 = vector.shape_cast %118 : vector<1x9x49xbf16> to vector<9x49xbf16>
    %cst_106 = arith.constant dense<0.000000e+00> : vector<9x8xf32>
    %120 = tpu.matmul %119, %84, %cst_106 {dimension_numbers = #tpu.dot_dimension_numbers<[1], [0], [0], [1], [0, 0, 1, 1], [], []>} : vector<9x49xbf16>, vector<49x8xbf16>, vector<9x8xf32> -> vector<9x8xf32>
    %121 = arith.truncf %120 : vector<9x8xf32> to vector<9x8xbf16>
    %c4_107 = arith.constant 4 : index
    %c0_108 = arith.constant 0 : index
    %c0_109 = arith.constant 0 : index
    %122 = vector.load %arg6[%c4_107, %c0_108, %c0_109] : memref<9x8x16xbf16, #tpu.memory_space<vmem>>, vector<1x8x16xbf16>
    %123 = vector.shape_cast %122 : vector<1x8x16xbf16> to vector<8x16xbf16>
    %cst_110 = arith.constant dense<0.000000e+00> : vector<9x16xf32>
    %124 = tpu.matmul %121, %123, %cst_110 {dimension_numbers = #tpu.dot_dimension_numbers<[1], [0], [0], [1], [0, 0, 1, 1], [], []>} : vector<9x8xbf16>, vector<8x16xbf16>, vector<9x16xf32> -> vector<9x16xf32>
    %125 = arith.addf %117, %124 : vector<9x16xf32>
    %c5_111 = arith.constant 5 : index
    %c0_112 = arith.constant 0 : index
    %c0_113 = arith.constant 0 : index
    %126 = vector.load %arg5[%c5_111, %c0_112, %c0_113] : memref<9x9x49xbf16, #tpu.memory_space<vmem>>, vector<1x9x49xbf16>
    %127 = vector.shape_cast %126 : vector<1x9x49xbf16> to vector<9x49xbf16>
    %cst_114 = arith.constant dense<0.000000e+00> : vector<9x8xf32>
    %128 = tpu.matmul %127, %84, %cst_114 {dimension_numbers = #tpu.dot_dimension_numbers<[1], [0], [0], [1], [0, 0, 1, 1], [], []>} : vector<9x49xbf16>, vector<49x8xbf16>, vector<9x8xf32> -> vector<9x8xf32>
    %129 = arith.truncf %128 : vector<9x8xf32> to vector<9x8xbf16>
    %c5_115 = arith.constant 5 : index
    %c0_116 = arith.constant 0 : index
    %c0_117 = arith.constant 0 : index
    %130 = vector.load %arg6[%c5_115, %c0_116, %c0_117] : memref<9x8x16xbf16, #tpu.memory_space<vmem>>, vector<1x8x16xbf16>
    %131 = vector.shape_cast %130 : vector<1x8x16xbf16> to vector<8x16xbf16>
    %cst_118 = arith.constant dense<0.000000e+00> : vector<9x16xf32>
    %132 = tpu.matmul %129, %131, %cst_118 {dimension_numbers = #tpu.dot_dimension_numbers<[1], [0], [0], [1], [0, 0, 1, 1], [], []>} : vector<9x8xbf16>, vector<8x16xbf16>, vector<9x16xf32> -> vector<9x16xf32>
    %133 = arith.addf %125, %132 : vector<9x16xf32>
    %c6_119 = arith.constant 6 : index
    %c0_120 = arith.constant 0 : index
    %c0_121 = arith.constant 0 : index
    %134 = vector.load %arg5[%c6_119, %c0_120, %c0_121] : memref<9x9x49xbf16, #tpu.memory_space<vmem>>, vector<1x9x49xbf16>
    %135 = vector.shape_cast %134 : vector<1x9x49xbf16> to vector<9x49xbf16>
    %cst_122 = arith.constant dense<0.000000e+00> : vector<9x8xf32>
    %136 = tpu.matmul %135, %84, %cst_122 {dimension_numbers = #tpu.dot_dimension_numbers<[1], [0], [0], [1], [0, 0, 1, 1], [], []>} : vector<9x49xbf16>, vector<49x8xbf16>, vector<9x8xf32> -> vector<9x8xf32>
    %137 = arith.truncf %136 : vector<9x8xf32> to vector<9x8xbf16>
    %c6_123 = arith.constant 6 : index
    %c0_124 = arith.constant 0 : index
    %c0_125 = arith.constant 0 : index
    %138 = vector.load %arg6[%c6_123, %c0_124, %c0_125] : memref<9x8x16xbf16, #tpu.memory_space<vmem>>, vector<1x8x16xbf16>
    %139 = vector.shape_cast %138 : vector<1x8x16xbf16> to vector<8x16xbf16>
    %cst_126 = arith.constant dense<0.000000e+00> : vector<9x16xf32>
    %140 = tpu.matmul %137, %139, %cst_126 {dimension_numbers = #tpu.dot_dimension_numbers<[1], [0], [0], [1], [0, 0, 1, 1], [], []>} : vector<9x8xbf16>, vector<8x16xbf16>, vector<9x16xf32> -> vector<9x16xf32>
    %141 = arith.addf %133, %140 : vector<9x16xf32>
    %c7_127 = arith.constant 7 : index
    %c0_128 = arith.constant 0 : index
    %c0_129 = arith.constant 0 : index
    %142 = vector.load %arg5[%c7_127, %c0_128, %c0_129] : memref<9x9x49xbf16, #tpu.memory_space<vmem>>, vector<1x9x49xbf16>
    %143 = vector.shape_cast %142 : vector<1x9x49xbf16> to vector<9x49xbf16>
    %cst_130 = arith.constant dense<0.000000e+00> : vector<9x8xf32>
    %144 = tpu.matmul %143, %84, %cst_130 {dimension_numbers = #tpu.dot_dimension_numbers<[1], [0], [0], [1], [0, 0, 1, 1], [], []>} : vector<9x49xbf16>, vector<49x8xbf16>, vector<9x8xf32> -> vector<9x8xf32>
    %145 = arith.truncf %144 : vector<9x8xf32> to vector<9x8xbf16>
    %c7_131 = arith.constant 7 : index
    %c0_132 = arith.constant 0 : index
    %c0_133 = arith.constant 0 : index
    %146 = vector.load %arg6[%c7_131, %c0_132, %c0_133] : memref<9x8x16xbf16, #tpu.memory_space<vmem>>, vector<1x8x16xbf16>
    %147 = vector.shape_cast %146 : vector<1x8x16xbf16> to vector<8x16xbf16>
    %cst_134 = arith.constant dense<0.000000e+00> : vector<9x16xf32>
    %148 = tpu.matmul %145, %147, %cst_134 {dimension_numbers = #tpu.dot_dimension_numbers<[1], [0], [0], [1], [0, 0, 1, 1], [], []>} : vector<9x8xbf16>, vector<8x16xbf16>, vector<9x16xf32> -> vector<9x16xf32>
    %149 = arith.addf %141, %148 : vector<9x16xf32>
    %c8_135 = arith.constant 8 : index
    %c0_136 = arith.constant 0 : index
    %c0_137 = arith.constant 0 : index
    %150 = vector.load %arg5[%c8_135, %c0_136, %c0_137] : memref<9x9x49xbf16, #tpu.memory_space<vmem>>, vector<1x9x49xbf16>
    %151 = vector.shape_cast %150 : vector<1x9x49xbf16> to vector<9x49xbf16>
    %cst_138 = arith.constant dense<0.000000e+00> : vector<9x8xf32>
    %152 = tpu.matmul %151, %84, %cst_138 {dimension_numbers = #tpu.dot_dimension_numbers<[1], [0], [0], [1], [0, 0, 1, 1], [], []>} : vector<9x49xbf16>, vector<49x8xbf16>, vector<9x8xf32> -> vector<9x8xf32>
    %153 = arith.truncf %152 : vector<9x8xf32> to vector<9x8xbf16>
    %c8_139 = arith.constant 8 : index
    %c0_140 = arith.constant 0 : index
    %c0_141 = arith.constant 0 : index
    %154 = vector.load %arg6[%c8_139, %c0_140, %c0_141] : memref<9x8x16xbf16, #tpu.memory_space<vmem>>, vector<1x8x16xbf16>
    %155 = vector.shape_cast %154 : vector<1x8x16xbf16> to vector<8x16xbf16>
    %cst_142 = arith.constant dense<0.000000e+00> : vector<9x16xf32>
    %156 = tpu.matmul %153, %155, %cst_142 {dimension_numbers = #tpu.dot_dimension_numbers<[1], [0], [0], [1], [0, 0, 1, 1], [], []>} : vector<9x8xbf16>, vector<8x16xbf16>, vector<9x16xf32> -> vector<9x16xf32>
    %157 = arith.addf %149, %156 : vector<9x16xf32>
    %c0_143 = arith.constant 0 : index
    %c0_144 = arith.constant 0 : index
    %158 = vector.load %arg7[%c0_143, %c0_144] : memref<1x16xf32, #tpu.memory_space<vmem>>, vector<1x16xf32>
    %159 = vector.broadcast %158 : vector<1x16xf32> to vector<9x16xf32>
    %160 = arith.addf %157, %159 : vector<9x16xf32>
    %cst_145 = arith.constant 0.000000e+00 : f32
    %161 = vector.broadcast %cst_145 : f32 to vector<9x16xf32>
    %162 = arith.cmpf ogt, %160, %161 : vector<9x16xf32>
    %cst_146 = arith.constant 2.000000e-01 : f32
    %163 = vector.broadcast %cst_146 : f32 to vector<9x16xf32>
    %164 = arith.mulf %163, %160 : vector<9x16xf32>
    %165 = arith.select %162, %160, %164 : vector<9x16xi1>, vector<9x16xf32>
    %166 = arith.truncf %165 : vector<9x16xf32> to vector<9x16xbf16>
    %cst_147 = arith.constant 0.000000e+00 : f32
    %167 = vector.broadcast %cst_147 : f32 to vector<1x32xf32>
    %168 = vector.extract_strided_slice %166 {offsets = [0, 0], sizes = [1, 16], strides = [1, 1]} : vector<9x16xbf16> to vector<1x16xbf16>
    %c0_148 = arith.constant 0 : index
    %c0_149 = arith.constant 0 : index
    %c0_150 = arith.constant 0 : index
    %169 = vector.load %arg8[%c0_148, %c0_149, %c0_150] : memref<9x16x32xbf16, #tpu.memory_space<vmem>>, vector<1x16x32xbf16>
    %170 = vector.shape_cast %169 : vector<1x16x32xbf16> to vector<16x32xbf16>
    %cst_151 = arith.constant dense<0.000000e+00> : vector<1x32xf32>
    %171 = tpu.matmul %168, %170, %cst_151 {dimension_numbers = #tpu.dot_dimension_numbers<[1], [0], [0], [1], [0, 0, 1, 1], [], []>} : vector<1x16xbf16>, vector<16x32xbf16>, vector<1x32xf32> -> vector<1x32xf32>
    %172 = arith.addf %167, %171 : vector<1x32xf32>
    %173 = vector.extract_strided_slice %166 {offsets = [1, 0], sizes = [1, 16], strides = [1, 1]} : vector<9x16xbf16> to vector<1x16xbf16>
    %c1_152 = arith.constant 1 : index
    %c0_153 = arith.constant 0 : index
    %c0_154 = arith.constant 0 : index
    %174 = vector.load %arg8[%c1_152, %c0_153, %c0_154] : memref<9x16x32xbf16, #tpu.memory_space<vmem>>, vector<1x16x32xbf16>
    %175 = vector.shape_cast %174 : vector<1x16x32xbf16> to vector<16x32xbf16>
    %cst_155 = arith.constant dense<0.000000e+00> : vector<1x32xf32>
    %176 = tpu.matmul %173, %175, %cst_155 {dimension_numbers = #tpu.dot_dimension_numbers<[1], [0], [0], [1], [0, 0, 1, 1], [], []>} : vector<1x16xbf16>, vector<16x32xbf16>, vector<1x32xf32> -> vector<1x32xf32>
    %177 = arith.addf %172, %176 : vector<1x32xf32>
    %178 = vector.extract_strided_slice %166 {offsets = [2, 0], sizes = [1, 16], strides = [1, 1]} : vector<9x16xbf16> to vector<1x16xbf16>
    %c2_156 = arith.constant 2 : index
    %c0_157 = arith.constant 0 : index
    %c0_158 = arith.constant 0 : index
    %179 = vector.load %arg8[%c2_156, %c0_157, %c0_158] : memref<9x16x32xbf16, #tpu.memory_space<vmem>>, vector<1x16x32xbf16>
    %180 = vector.shape_cast %179 : vector<1x16x32xbf16> to vector<16x32xbf16>
    %cst_159 = arith.constant dense<0.000000e+00> : vector<1x32xf32>
    %181 = tpu.matmul %178, %180, %cst_159 {dimension_numbers = #tpu.dot_dimension_numbers<[1], [0], [0], [1], [0, 0, 1, 1], [], []>} : vector<1x16xbf16>, vector<16x32xbf16>, vector<1x32xf32> -> vector<1x32xf32>
    %182 = arith.addf %177, %181 : vector<1x32xf32>
    %183 = vector.extract_strided_slice %166 {offsets = [3, 0], sizes = [1, 16], strides = [1, 1]} : vector<9x16xbf16> to vector<1x16xbf16>
    %c3_160 = arith.constant 3 : index
    %c0_161 = arith.constant 0 : index
    %c0_162 = arith.constant 0 : index
    %184 = vector.load %arg8[%c3_160, %c0_161, %c0_162] : memref<9x16x32xbf16, #tpu.memory_space<vmem>>, vector<1x16x32xbf16>
    %185 = vector.shape_cast %184 : vector<1x16x32xbf16> to vector<16x32xbf16>
    %cst_163 = arith.constant dense<0.000000e+00> : vector<1x32xf32>
    %186 = tpu.matmul %183, %185, %cst_163 {dimension_numbers = #tpu.dot_dimension_numbers<[1], [0], [0], [1], [0, 0, 1, 1], [], []>} : vector<1x16xbf16>, vector<16x32xbf16>, vector<1x32xf32> -> vector<1x32xf32>
    %187 = arith.addf %182, %186 : vector<1x32xf32>
    %188 = vector.extract_strided_slice %166 {offsets = [4, 0], sizes = [1, 16], strides = [1, 1]} : vector<9x16xbf16> to vector<1x16xbf16>
    %c4_164 = arith.constant 4 : index
    %c0_165 = arith.constant 0 : index
    %c0_166 = arith.constant 0 : index
    %189 = vector.load %arg8[%c4_164, %c0_165, %c0_166] : memref<9x16x32xbf16, #tpu.memory_space<vmem>>, vector<1x16x32xbf16>
    %190 = vector.shape_cast %189 : vector<1x16x32xbf16> to vector<16x32xbf16>
    %cst_167 = arith.constant dense<0.000000e+00> : vector<1x32xf32>
    %191 = tpu.matmul %188, %190, %cst_167 {dimension_numbers = #tpu.dot_dimension_numbers<[1], [0], [0], [1], [0, 0, 1, 1], [], []>} : vector<1x16xbf16>, vector<16x32xbf16>, vector<1x32xf32> -> vector<1x32xf32>
    %192 = arith.addf %187, %191 : vector<1x32xf32>
    %193 = vector.extract_strided_slice %166 {offsets = [5, 0], sizes = [1, 16], strides = [1, 1]} : vector<9x16xbf16> to vector<1x16xbf16>
    %c5_168 = arith.constant 5 : index
    %c0_169 = arith.constant 0 : index
    %c0_170 = arith.constant 0 : index
    %194 = vector.load %arg8[%c5_168, %c0_169, %c0_170] : memref<9x16x32xbf16, #tpu.memory_space<vmem>>, vector<1x16x32xbf16>
    %195 = vector.shape_cast %194 : vector<1x16x32xbf16> to vector<16x32xbf16>
    %cst_171 = arith.constant dense<0.000000e+00> : vector<1x32xf32>
    %196 = tpu.matmul %193, %195, %cst_171 {dimension_numbers = #tpu.dot_dimension_numbers<[1], [0], [0], [1], [0, 0, 1, 1], [], []>} : vector<1x16xbf16>, vector<16x32xbf16>, vector<1x32xf32> -> vector<1x32xf32>
    %197 = arith.addf %192, %196 : vector<1x32xf32>
    %198 = vector.extract_strided_slice %166 {offsets = [6, 0], sizes = [1, 16], strides = [1, 1]} : vector<9x16xbf16> to vector<1x16xbf16>
    %c6_172 = arith.constant 6 : index
    %c0_173 = arith.constant 0 : index
    %c0_174 = arith.constant 0 : index
    %199 = vector.load %arg8[%c6_172, %c0_173, %c0_174] : memref<9x16x32xbf16, #tpu.memory_space<vmem>>, vector<1x16x32xbf16>
    %200 = vector.shape_cast %199 : vector<1x16x32xbf16> to vector<16x32xbf16>
    %cst_175 = arith.constant dense<0.000000e+00> : vector<1x32xf32>
    %201 = tpu.matmul %198, %200, %cst_175 {dimension_numbers = #tpu.dot_dimension_numbers<[1], [0], [0], [1], [0, 0, 1, 1], [], []>} : vector<1x16xbf16>, vector<16x32xbf16>, vector<1x32xf32> -> vector<1x32xf32>
    %202 = arith.addf %197, %201 : vector<1x32xf32>
    %203 = vector.extract_strided_slice %166 {offsets = [7, 0], sizes = [1, 16], strides = [1, 1]} : vector<9x16xbf16> to vector<1x16xbf16>
    %c7_176 = arith.constant 7 : index
    %c0_177 = arith.constant 0 : index
    %c0_178 = arith.constant 0 : index
    %204 = vector.load %arg8[%c7_176, %c0_177, %c0_178] : memref<9x16x32xbf16, #tpu.memory_space<vmem>>, vector<1x16x32xbf16>
    %205 = vector.shape_cast %204 : vector<1x16x32xbf16> to vector<16x32xbf16>
    %cst_179 = arith.constant dense<0.000000e+00> : vector<1x32xf32>
    %206 = tpu.matmul %203, %205, %cst_179 {dimension_numbers = #tpu.dot_dimension_numbers<[1], [0], [0], [1], [0, 0, 1, 1], [], []>} : vector<1x16xbf16>, vector<16x32xbf16>, vector<1x32xf32> -> vector<1x32xf32>
    %207 = arith.addf %202, %206 : vector<1x32xf32>
    %208 = vector.extract_strided_slice %166 {offsets = [8, 0], sizes = [1, 16], strides = [1, 1]} : vector<9x16xbf16> to vector<1x16xbf16>
    %c8_180 = arith.constant 8 : index
    %c0_181 = arith.constant 0 : index
    %c0_182 = arith.constant 0 : index
    %209 = vector.load %arg8[%c8_180, %c0_181, %c0_182] : memref<9x16x32xbf16, #tpu.memory_space<vmem>>, vector<1x16x32xbf16>
    %210 = vector.shape_cast %209 : vector<1x16x32xbf16> to vector<16x32xbf16>
    %cst_183 = arith.constant dense<0.000000e+00> : vector<1x32xf32>
    %211 = tpu.matmul %208, %210, %cst_183 {dimension_numbers = #tpu.dot_dimension_numbers<[1], [0], [0], [1], [0, 0, 1, 1], [], []>} : vector<1x16xbf16>, vector<16x32xbf16>, vector<1x32xf32> -> vector<1x32xf32>
    %212 = arith.addf %207, %211 : vector<1x32xf32>
    %c0_184 = arith.constant 0 : index
    %c0_185 = arith.constant 0 : index
    %213 = vector.load %arg9[%c0_184, %c0_185] : memref<1x32xf32, #tpu.memory_space<vmem>>, vector<1x32xf32>
    %214 = arith.addf %212, %213 : vector<1x32xf32>
    %c0_186 = arith.constant 0 : index
    %c0_187 = arith.constant 0 : index
    %c0_188 = arith.constant 0 : index
    %215 = vector.load %arg10[%c0_186, %c0_187, %c0_188] : memref<1x1x32xf32, #tpu.memory_space<vmem>>, vector<1x1x32xf32>
    %216 = vector.shape_cast %215 : vector<1x1x32xf32> to vector<1x32xf32>
    %217 = vector.shape_cast %214 : vector<1x32xf32> to vector<1x1x32xf32>
    tpu.vector_store %arg10[%c0_186, %c0_187, %c0_188], %217 {strides = array<i32>} : memref<1x1x32xf32, #tpu.memory_space<vmem>>, vector<1x1x32xf32>,
    return
  }
  func.func @transform_0(%arg0: i32) -> (i32, i32, i32) {
    %c0_i32 = arith.constant 0 : i32
    %c0_i32_0 = arith.constant 0 : i32
    %c0_i32_1 = arith.constant 0 : i32
    return %arg0, %c0_i32, %c0_i32_0 : i32, i32, i32
  }
  func.func @transform_1(%arg0: i32) -> (i32, i32, i32) {
    %c0_i32 = arith.constant 0 : i32
    %c0_i32_0 = arith.constant 0 : i32
    %c0_i32_1 = arith.constant 0 : i32
    %c0_i32_2 = arith.constant 0 : i32
    return %c0_i32, %c0_i32_0, %c0_i32_1 : i32, i32, i32
  }
  func.func @transform_2(%arg0: i32) -> (i32, i32, i32) {
    %c0_i32 = arith.constant 0 : i32
    %c0_i32_0 = arith.constant 0 : i32
    %c0_i32_1 = arith.constant 0 : i32
    %c0_i32_2 = arith.constant 0 : i32
    return %c0_i32, %c0_i32_0, %c0_i32_1 : i32, i32, i32
  }
  func.func @transform_3(%arg0: i32) -> (i32, i32) {
    %c0_i32 = arith.constant 0 : i32
    %c0_i32_0 = arith.constant 0 : i32
    %c0_i32_1 = arith.constant 0 : i32
    return %c0_i32, %c0_i32_0 : i32, i32
  }
  func.func @transform_4(%arg0: i32) -> (i32, i32, i32) {
    %c0_i32 = arith.constant 0 : i32
    %c0_i32_0 = arith.constant 0 : i32
    %c0_i32_1 = arith.constant 0 : i32
    %c0_i32_2 = arith.constant 0 : i32
    return %c0_i32, %c0_i32_0, %c0_i32_1 : i32, i32, i32
  }
  func.func @transform_5(%arg0: i32) -> (i32, i32, i32) {
    %c0_i32 = arith.constant 0 : i32
    %c0_i32_0 = arith.constant 0 : i32
    %c0_i32_1 = arith.constant 0 : i32
    %c0_i32_2 = arith.constant 0 : i32
    return %c0_i32, %c0_i32_0, %c0_i32_1 : i32, i32, i32
  }
  func.func @transform_6(%arg0: i32) -> (i32, i32) {
    %c0_i32 = arith.constant 0 : i32
    %c0_i32_0 = arith.constant 0 : i32
    %c0_i32_1 = arith.constant 0 : i32
    return %c0_i32, %c0_i32_0 : i32, i32
  }
  func.func @transform_7(%arg0: i32) -> (i32, i32, i32) {
    %c0_i32 = arith.constant 0 : i32
    %c0_i32_0 = arith.constant 0 : i32
    %c0_i32_1 = arith.constant 0 : i32
    %c0_i32_2 = arith.constant 0 : i32
    return %c0_i32, %c0_i32_0, %c0_i32_1 : i32, i32, i32
  }
  func.func @transform_8(%arg0: i32) -> (i32, i32) {
    %c0_i32 = arith.constant 0 : i32
    %c0_i32_0 = arith.constant 0 : i32
    %c0_i32_1 = arith.constant 0 : i32
    return %c0_i32, %c0_i32_0 : i32, i32
  }
  func.func @transform_9(%arg0: i32) -> (i32, i32, i32) {
    %c0_i32 = arith.constant 0 : i32
    %c0_i32_0 = arith.constant 0 : i32
    %c0_i32_1 = arith.constant 0 : i32
    return %arg0, %c0_i32, %c0_i32_0 : i32, i32, i32
  }
}

</mosaic_0001>

<bundles_post_ra>
// kernel: map_cnn_forward.1
= control target key start
LH: loop header
LB: loop body
LE: loop exit
PB: predicated region body
PF: predicated region fallthrough
CT: control target
= control target key end

     0   :  { %14 = vsyncpa [#allocation3], 0  ;;  %s6086_s0 = inlined_call_operand.vmem [shape: f32[2,256,4], index: 0, kind: input, shape index: {}]   ;;  %s6087_s1 = inlined_call_operand.vmem [shape: bf16[9,49,256], index: 1, kind: input, shape index: {}]   ;;  %s6088_s2 = inlined_call_operand.vmem [shape: bf16[9,4,8], index: 2, kind: input, shape index: {}]   ;;  %s6089_s3 = inlined_call_operand.vmem [shape: f32[1,8], index: 3, kind: input, shape index: {}]   ;;  %s6090_s4 = inlined_call_operand.vmem [shape: bf16[9,9,49], index: 4, kind: input, shape index: {}]   ;;  %s6091_s5 = inlined_call_operand.vmem [shape: bf16[9,8,16], index: 5, kind: input, shape index: {}]   ;;  %s6092_s6 = inlined_call_operand.vmem [shape: f32[1,16], index: 6, kind: input, shape index: {}]   ;;  %s6093_s7 = inlined_call_operand.vmem [shape: bf16[9,16,32], index: 7, kind: input, shape index: {}]   ;;  %s6094_s8 = inlined_call_operand.vmem [shape: f32[1,32], index: 8, kind: input, shape index: {}]   ;;  %s6095_s9 = inlined_call_operand.hbm [shape: f32[2,1,32], index: 9, kind: output, shape index: {}]  }
   0x1   :  { %16 = vsyncpa [#allocation3 + $0x1], 0  ;;  %s5104_s30 = smov 0   ;;  %s5106_s10 = smov 0  }
   0x2   :  { %s5108_s11 = smov 0   ;;  %s5110_s12 = smov 0  }
   0x3 LB: > { %s5125_s13 = sadd.s32 4294967295, %s5048_s12   ;;  %s3725_s14 = sadd.s32 4294967294, %s5048_s12   ;;  %s5048_s12 = sphi %s5110_s12, %s6101_s12   ;;  %s5044_s11 = sphi %s5108_s11, %s6100_s11   ;;  %s5040_s10 = sphi %s5106_s10, %s6099_s10   ;;  %s5036_s30 = sphi %s5104_s30, %s6098_s30  }
   0x4   : > { %s5129_s15 = sadd.s32 1, %s5048_s12   ;;  %s223_s16 = sadd.s32 1, %s5044_s11 }
   0x5   : > { %s220_s17 = ssub.s32 %s5048_s12, %s5129_s15  ;;  %p233_p0 = scmp.ne.s32.totalorder %s5044_s11, %s5040_s10 }
   0x6   : > { %p221_p1 = scmp.eq.s32.totalorder %s220_s17, 0  ;;  %p234_p2 = scmp.eq.s32.totalorder %s5125_s13, 1 }
   0x7   : > { %p239_p3 = scmp.ne.s32.totalorder %s5040_s10, %s5036_s30  ;;  %p240_p4 = scmp.eq.s32.totalorder %s3725_s14, 1 }
   0x8   : > { %s5140_s18 = scalar_select %p221_p1, %s5044_s11, %s223_s16  }
   0x9   : > { %p5142_p5 = por %p234_p2, %p233_p0  ;;  %p5146_p6 = por %p240_p4, %p239_p3 }
   0xa   : > { %p3728_p7 = scmp.ge.s32.totalorder %s5048_s12, 1  ;;  %p290_p8 = scmp.lt.s32.totalorder %s5048_s12, 3 }
   0xc   : > { %p291_p9 = pnand %p3728_p7, %p290_p8 }
   0xd   : > { %p325_p10 = scmp.lt.s32.totalorder (!%p291_p9), %s5125_s13, 1  ;;  %v4871_v0 = vld [vmem:[%s6087_s1 + $0x3c] ss:$8 sps:$4 sm:$0xff] (!%p291_p9)   ;;  %v4869_v50 = vld [vmem:[%s6087_s1 + $0x38] ss:$8 sps:$4 sm:$0xff] (!%p291_p9)   ;;  %vm620_vm0 = vcmask (!%p291_p9), 1041408  }
   0xe   : > { %294 = sbr.rel (%p291_p9) target bundleno = 3262 (0xcbe), region = 56  ;;  %569 = vmatprep.mubr.bf16.mxu1 (!%p291_p9), %v4871_v0  ;;  %v4877_v1 = vld [vmem:[%s6087_s1 + $0x4] ss:$8 sps:$4 sm:$0xff] (!%p291_p9)   ;;  %v4875_v51 = vld [vmem:[%s6087_s1] ss:$8 sps:$4 sm:$0xff] (!%p291_p9)   ;;  %vm607_vm1 = vcmask (!%p291_p9), 31744  }
   0xf   : > { %455 = vmatprep.mubr.bf16.mxu0 (!%p291_p9), %v4877_v1  ;;  %v4872_v52 = vld [vmem:[%s6087_s1 + $0x4c] ss:$8 sps:$4 sm:$0xff] (!%p291_p9)   ;;  %v4874_v54 = vld [vmem:[%s6087_s1 + $0x48] ss:$8 sps:$4 sm:$0xff] (!%p291_p9)   ;;  %v4878_v56 = vld [vmem:[%s6087_s1 + $0x5c] ss:$8 sps:$4 sm:$0xff] (!%p291_p9)  }
  0x10   : > { %v4881_v53 = vld [vmem:[%s6087_s1 + $0x14] ss:$8 sps:$4 sm:$0xff] (!%p291_p9)   ;;  %v4884_v55 = vld [vmem:[%s6087_s1 + $0x10] ss:$8 sps:$4 sm:$0xff] (!%p291_p9)   ;;  %v4886_v57 = vld [vmem:[%s6087_s1 + $0x24] ss:$8 sps:$4 sm:$0xff] (!%p291_p9)  }
  0x11   : > { %v3745_v58 = vld [vmem:[%s6087_s1 + $0x68] sm:$0x11] (!%p291_p9)  ;;  %v385_v59 = vld [vmem:[%s6087_s1 + $0x30] sm:$0x11] (!%p291_p9)  ;;  %v4880_v60 = vld [vmem:[%s6087_s1 + $0x58] ss:$8 sps:$4 sm:$0xff] (!%p291_p9)  }
  0x12   : > { %v4891_v61 = vld [vmem:[%s6087_s1 + $0x20] ss:$8 sps:$4 sm:$0xff] (!%p291_p9)   ;;  %v3753_v62 = vcombine.high (!%p291_p9), %v3745_v58, %v3745_v58  ;;  %v3738_v63 = vcombine.high (!%p291_p9), %v385_v59, %v385_v59  ;;  %v3752_v0 = vcombine.low (!%p291_p9), %v3745_v58, %v3745_v58  ;;  %v3737_v1 = vcombine.low (!%p291_p9), %v385_v59, %v385_v59  ;;  %v4927_v58 = vld [vmem:[%s6087_s1 + $0x164] ss:$8 sps:$4 sm:$0xff] (!%p291_p9)   ;;  %s323_s24 = sand.u32 (!%p291_p9), 1, %s5040_s10   ;;  %s3990_s27 = sshll.u32 (!%p291_p9), %s5125_s13, 4 }
  0x13   : > { %vm5051_vm2 = vmmov (!%p291_p9), 0   ;;  %vm2224_vm10 = vcmask (!%p291_p9), 1040384   ;;  %vm2220_vm11 = vcmask (!%p291_p9), 400384   ;;  %vm2332_vm12 = vcmask (!%p291_p9), 1043456   ;;  %s324_s28 = scalar_lea.vmem (!%p291_p9), [#allocation2], %s323_s24  ;;  %s6044_s17 = scalar_lea.hbm (!%p291_p9), %s6095_s9, %s3990_s27 }
  0x14   : > { %vm2328_vm13 = vcmask (!%p291_p9), 64512   ;;  %s5053_s22 = smov (!%p291_p9), [#allocation2]  }
  0x15   : > { %s326_s23 = scalar_select %p325_p10, %s5125_s13, 1 }
  0x16   : > { %s3658_s13 = scalar_lea.sflag [#allocation3], %s323_s24 }
  0x17   : > { %s3993_s26 = sshll.u32 %s326_s23, 8  ;;  %s4990_s23 = sshll.u32 %s5053_s22, 4  ;;  %s4991_s23 = int_to_ptr.vmem [resolvable:$false] %s4990_s23 }
  0x18   : > { %s5163_s29 = scalar_lea.vmem %s6086_s0, %s3993_s26  ;;  %s4992_s25 = scalar_lea.vmem %s4991_s23, 32 }
  0x19   : > { %v347_v2 = vld [vmem:[%s5163_s29 + $0x80] sm:$0xff]  ;;  %v348_v3 = vld [vmem:[%s5163_s29 + $0x88] sm:$0xff]  ;;  %v349_v7 = vld [vmem:[%s5163_s29 + $0x90] sm:$0xff] }
  0x1a   : > { %v331_v4 = vld [vmem:[%s5163_s29] sm:$0xff]  ;;  %v5168_v5 = vpack.c.bf16 %v348_v3, %v347_v2  ;;  %v332_v6 = vld [vmem:[%s5163_s29 + $0x8] sm:$0xff]  ;;  %v350_v8 = vld [vmem:[%s5163_s29 + $0x98] sm:$0xff] }
  0x1b   : > { %v5173_v9 = vpack.c.bf16 %v332_v6, %v331_v4  ;;  %v5175_v10 = vpack.c.bf16 %v350_v8, %v349_v7  ;;  %v333_v11 = vld [vmem:[%s5163_s29 + $0x10] sm:$0xff]  ;;  %v334_v12 = vld [vmem:[%s5163_s29 + $0x18] sm:$0xff]  ;;  %v351_v13 = vld [vmem:[%s5163_s29 + $0xa0] sm:$0xff] }
  0x1c   : > { %4034 = vmatprep.subr.bf16.mxu1 %v5168_v5  ;;  %v352_v14 = vld [vmem:[%s5163_s29 + $0xa8] sm:$0xff]  ;;  %3994 = vmatprep.subr.bf16.mxu0 %v5168_v5  ;;  %v5184_v15 = vpack.c.bf16 %v334_v12, %v333_v11  ;;  %v335_v17 = vld [vmem:[%s5163_s29 + $0x20] sm:$0xff]  ;;  %v353_v19 = vld [vmem:[%s5163_s29 + $0xb0] sm:$0xff] }
  0x1d   : > { %4035 = vmatpush3.bf16.msra.mxu1 %v5173_v9  ;;  %3995 = vmatpush3.bf16.msra.mxu0 %v5173_v9  ;;  %v5188_v16 = vpack.c.bf16 %v352_v14, %v351_v13  ;;  %v336_v18 = vld [vmem:[%s5163_s29 + $0x28] sm:$0xff]  ;;  %v354_v20 = vld [vmem:[%s5163_s29 + $0xb8] sm:$0xff]  ;;  %v337_v23 = vld [vmem:[%s5163_s29 + $0x30] sm:$0xff] }
  0x1e   : > { %4036 = vmatprep.subr.bf16.mxu1 %v5175_v10  ;;  %3996 = vmatprep.subr.bf16.mxu0 %v5175_v10  ;;  %v5196_v21 = vpack.c.bf16 %v336_v18, %v335_v17  ;;  %v5200_v22 = vpack.c.bf16 %v354_v20, %v353_v19  ;;  %v338_v24 = vld [vmem:[%s5163_s29 + $0x38] sm:$0xff]  ;;  %v355_v25 = vld [vmem:[%s5163_s29 + $0xc0] sm:$0xff]  ;;  %v356_v26 = vld [vmem:[%s5163_s29 + $0xc8] sm:$0xff] }
  0x1f   : > { %v5208_v27 = vpack.c.bf16 %v338_v24, %v337_v23  ;;  %v5212_v28 = vpack.c.bf16 %v356_v26, %v355_v25  ;;  %v339_v29 = vld [vmem:[%s5163_s29 + $0x40] sm:$0xff]  ;;  %v340_v30 = vld [vmem:[%s5163_s29 + $0x48] sm:$0xff]  ;;  %v357_v31 = vld [vmem:[%s5163_s29 + $0xd0] sm:$0xff] }
  0x20   : > { %v358_v32 = vld [vmem:[%s5163_s29 + $0xd8] sm:$0xff]  ;;  %v5220_v33 = vpack.c.bf16 %v340_v30, %v339_v29  ;;  %v341_v35 = vld [vmem:[%s5163_s29 + $0x50] sm:$0xff]  ;;  %v359_v37 = vld [vmem:[%s5163_s29 + $0xe0] sm:$0xff] }
  0x21   : > { %4037 = vmatpush3.bf16.msra.mxu1 %v5184_v15  ;;  %3997 = vmatpush3.bf16.msra.mxu0 %v5184_v15  ;;  %v5224_v34 = vpack.c.bf16 %v358_v32, %v357_v31  ;;  %v342_v36 = vld [vmem:[%s5163_s29 + $0x58] sm:$0xff]  ;;  %v360_v38 = vld [vmem:[%s5163_s29 + $0xe8] sm:$0xff]  ;;  %v343_v41 = vld [vmem:[%s5163_s29 + $0x60] sm:$0xff] }
  0x22   : > { %4038 = vmatprep.subr.bf16.mxu1 %v5188_v16  ;;  %3998 = vmatprep.subr.bf16.mxu0 %v5188_v16  ;;  %v5232_v39 = vpack.c.bf16 %v342_v36, %v341_v35  ;;  %v5236_v40 = vpack.c.bf16 %v360_v38, %v359_v37  ;;  %v344_v42 = vld [vmem:[%s5163_s29 + $0x68] sm:$0xff]  ;;  %v361_v43 = vld [vmem:[%s5163_s29 + $0xf0] sm:$0xff]  ;;  %v362_v44 = vld [vmem:[%s5163_s29 + $0xf8] sm:$0xff] }
  0x23   : > { %v5244_v45 = vpack.c.bf16 %v344_v42, %v343_v41  ;;  %v5248_v46 = vpack.c.bf16 %v362_v44, %v361_v43  ;;  %v345_v47 = vld [vmem:[%s5163_s29 + $0x70] sm:$0xff]  ;;  %v346_v48 = vld [vmem:[%s5163_s29 + $0x78] sm:$0xff]  ;;  %v4893_v4 = vld [vmem:[%s6087_s1 + $0x84] ss:$8 sps:$4 sm:$0xff]   ;;  %s3670_s29 = sshll.u32 %s324_s28, 4  ;;  %s6046_s29 = int_to_ptr.vmem [resolvable:$true] %s3670_s29 }
  0x24   : > { %v5254_v49 = vpack.c.bf16 %v346_v48, %v345_v47  ;;  %v4890_v2 = vld [vmem:[%s6087_s1 + $0x74] ss:$8 sps:$4 sm:$0xff]   ;;  %v4888_v3 = vld [vmem:[%s6087_s1 + $0x70] ss:$8 sps:$4 sm:$0xff]   ;;  %v4896_v6 = vld [vmem:[%s6087_s1 + $0x80] ss:$8 sps:$4 sm:$0xff]   ;;  %p4993_p0 = scmp.lt.s32.totalorder %s6046_s29, %s4991_s23 }
  0x25   : > { %4039 = vmatpush3.bf16.msra.mxu1 %v5196_v21  ;;  %3999 = vmatpush3.bf16.msra.mxu0 %v5196_v21  ;;  %v4897_v7 = vld [vmem:[%s6087_s1 + $0x94] ss:$8 sps:$4 sm:$0xff]   ;;  %v3769_v8 = vld [vmem:[%s6087_s1 + $0xa0] sm:$0x11]  ;;  %v4899_v11 = vld [vmem:[%s6087_s1 + $0x90] ss:$8 sps:$4 sm:$0xff]  }
  0x26   : > { %4040 = vmatprep.subr.bf16.mxu1 %v5200_v22  ;;  %4000 = vmatprep.subr.bf16.mxu0 %v5200_v22  ;;  %v3777_v12 = vcombine.high %v3769_v8, %v3769_v8  ;;  %v3776_v13 = vcombine.low %v3769_v8, %v3769_v8  ;;  %v4904_v14 = vld [vmem:[%s6087_s1 + $0xac] ss:$8 sps:$4 sm:$0xff]   ;;  %v4902_v17 = vld [vmem:[%s6087_s1 + $0xa8] ss:$8 sps:$4 sm:$0xff]   ;;  %v4905_v18 = vld [vmem:[%s6087_s1 + $0xbc] ss:$8 sps:$4 sm:$0xff]  }
  0x27   : > { %v4907_v19 = vld [vmem:[%s6087_s1 + $0xb8] ss:$8 sps:$4 sm:$0xff]   ;;  %v4908_v20 = vld [vmem:[%s6087_s1 + $0xcc] ss:$8 sps:$4 sm:$0xff]   ;;  %v4910_v24 = vld [vmem:[%s6087_s1 + $0xc8] ss:$8 sps:$4 sm:$0xff]  }
  0x28   : > { %v3789_v23 = vld [vmem:[%s6087_s1 + $0xd8] sm:$0x11]  ;;  %v4915_v29 = vld [vmem:[%s6087_s1 + $0xe4] ss:$8 sps:$4 sm:$0xff]   ;;  %v4913_v30 = vld [vmem:[%s6087_s1 + $0xe0] ss:$8 sps:$4 sm:$0xff]  }
  0x29   : > { %4041 = vmatpush3.bf16.msra.mxu1 %v5208_v27  ;;  %4001 = vmatpush3.bf16.msra.mxu0 %v5208_v27  ;;  %v3797_v25 = vcombine.high %v3789_v23, %v3789_v23  ;;  %v3796_v26 = vcombine.low %v3789_v23, %v3789_v23  ;;  %v4916_v31 = vld [vmem:[%s6087_s1 + $0xf4] ss:$8 sps:$4 sm:$0xff]   ;;  %v3754_v32 = vld [vmem:[%s6088_s2 + $0x2] sm:$0x3]  ;;  %v4918_v36 = vld [vmem:[%s6087_s1 + $0xf0] ss:$8 sps:$4 sm:$0xff]  }
  0x2a   : > { %4042 = vmatprep.subr.bf16.mxu1 %v5212_v28  ;;  %4002 = vmatprep.subr.bf16.mxu0 %v5212_v28  ;;  %v622_v35 = vsel %vm620_vm0, %v3754_v32, 0  ;;  %v4919_v37 = vld [vmem:[%s6087_s1 + $0x104] ss:$8 sps:$4 sm:$0xff]   ;;  %v3809_v38 = vld [vmem:[%s6087_s1 + $0x110] sm:$0x11]  ;;  %s4986_s21 = scalar_lea.vmem %s6046_s29, 16 }
  0x2b   : > { %v4921_v41 = vld [vmem:[%s6087_s1 + $0x100] ss:$8 sps:$4 sm:$0xff]   ;;  %v3817_v42 = vcombine.high %v3809_v38, %v3809_v38  ;;  %v3816_v43 = vcombine.low %v3809_v38, %v3809_v38  ;;  %v4926_v47 = vld [vmem:[%s6087_s1 + $0x154] ss:$8 sps:$4 sm:$0xff]   ;;  %v4924_v48 = vld [vmem:[%s6087_s1 + $0x150] ss:$8 sps:$4 sm:$0xff]   ;;  %p4987_p11 = scmp.ne.s32.totalorder %s6046_s29, %s4986_s21  ;;  %p4994_p1 = scmp.lt.s32.totalorder %s4992_s25, %s4986_s21 }
  0x2c   : > { %v491_v44 = vld [vmem:[%s6088_s2] sm:$0x3] }
  0x2d   : > { %4043 = vmatpush3.bf16.msra.mxu1 %v5220_v33  ;;  %4003 = vmatpush3.bf16.msra.mxu0 %v5220_v33  ;;  %p4988_p12 = pnand %p4987_p11, %p5142_p5  ;;  %p4995_p2 = por %p4994_p1, %p4993_p0 }
  0x2e   : > { %4044 = vmatprep.subr.bf16.mxu1 %v5224_v34  ;;  %4004 = vmatprep.subr.bf16.mxu0 %v5224_v34 }
  0x2f   : > { %p4989_p13 = pneg %p4988_p12 }
  0x31   : > { %4045 = vmatpush3.bf16.msra.mxu1 %v5232_v39  ;;  %4005 = vmatpush3.bf16.msra.mxu0 %v5232_v39  ;;  %p4996_p3 = pnand %p4995_p2, %p4989_p13 }
  0x32   : > { %4046 = vmatprep.subr.bf16.mxu1 %v5236_v40  ;;  %4006 = vmatprep.subr.bf16.mxu0 %v5236_v40 }
  0x35   : > { %4047 = vmatpush3.bf16.msra.mxu1 %v5244_v45  ;;  %4007 = vmatpush3.bf16.msra.mxu0 %v5244_v45 }
  0x36   : > { %4048 = vmatprep.subr.bf16.mxu1 %v5248_v46  ;;  %4008 = vmatprep.subr.bf16.mxu0 %v5248_v46 }
  0x39   : > { %4049 = vmatpush3.bf16.msra.mxu1 %v5254_v49  ;;  %4009 = vmatpush3.bf16.msra.mxu0 %v5254_v49 }
  0x3a   : > { %4084 = vmatprep.subr.bf16.mxu1 %v5168_v5  ;;  %4818 = vmatprep.subr.msk.bf16.mxu0 %vm620_vm0, %v3754_v32 }
  0x3c   : > { %570 = vmatmul.mubr.bf16.vlgmr.msra.gmra.mrb[0].mxu1 %v4869_v50  ;;  %456 = vmatmul.mubr.bf16.vlgmr.msra.gmra.mrb[0].mxu0 %v4875_v51 }
  0x3d   : > { %4085 = vmatpush3.bf16.msra.mxu1 %v5173_v9  ;;  %577 = vmatprep.mubr.bf16.mxu1 %v4872_v52 }
  0x3e   : > { %4086 = vmatprep.subr.bf16.mxu1 %v5175_v10  ;;  %463 = vmatprep.mubr.bf16.mxu0 %v4881_v53 }
  0x3f   : > { %4481 = vmatpush3.bf16.msra.mxu0 %v622_v35  ;;  %v3849_v35 = vld [vmem:[%s6087_s1 + $0x180] sm:$0x11] }
  0x40   : > { %4819 = vmatprep.subr.msk.bf16.mxu0 %vm620_vm0, %v491_v44 }
  0x41   : > { %4087 = vmatpush3.bf16.msra.mxu1 %v5184_v15 }
  0x42   : > { %4088 = vmatprep.subr.bf16.mxu1 %v5188_v16 }
  0x44   : > { %578 = vmatmul.mubr.bf16.gmra.mrb[4].mxu1 %v4874_v54  ;;  %464 = vmatmul.mubr.bf16.gmra.mrb[4].mxu0 %v4884_v55 }
  0x45   : > { %4089 = vmatpush3.bf16.msra.mxu1 %v5196_v21  ;;  %585 = vmatprep.mubr.bf16.mxu1 %v4878_v56 }
  0x46   : > { %4090 = vmatprep.subr.bf16.mxu1 %v5200_v22  ;;  %471 = vmatprep.mubr.bf16.mxu0 %v4886_v57 }
  0x49   : > { %4091 = vmatpush3.bf16.msra.mxu1 %v5208_v27 }
  0x4a   : > { %4092 = vmatprep.subr.bf16.mxu1 %v5212_v28 }
  0x4c   : > { %586 = vmatmul.mubr.bf16.gmra.mrb[8].mxu1 %v4880_v60  ;;  %472 = vmatmul.mubr.bf16.gmra.mrb[8].mxu0 %v4891_v61  ;;  %v4929_v61 = vld [vmem:[%s6087_s1 + $0x160] ss:$8 sps:$4 sm:$0xff]  }
  0x4d   : > { %4093 = vmatpush3.bf16.msra.mxu1 %v5220_v33  ;;  %593 = vmatprep.mubr.bf16.mxu1 %v3753_v62 }
  0x4e   : > { %4094 = vmatprep.subr.bf16.mxu1 %v5224_v34  ;;  %479 = vmatprep.mubr.bf16.mxu0 %v3738_v63 }
  0x51   : > { %4095 = vmatpush3.bf16.msra.mxu1 %v5232_v39 }
  0x52   : > { %4096 = vmatprep.subr.bf16.mxu1 %v5236_v40 }
  0x54   : > { %594 = vmatmul.mubr.bf16.gmra.mrb[12].mxu1 %v3752_v0  ;;  %480 = vmatmul.mubr.bf16.gmra.mrb[12].mxu0 %v3737_v1 }
  0x55   : > { %4097 = vmatpush3.bf16.msra.mxu1 %v5244_v45  ;;  %844 = vmatprep.mubr.bf16.mxu1 %v4890_v2 }
  0x56   : > { %4098 = vmatprep.subr.bf16.mxu1 %v5248_v46 }
  0x59   : > { %4099 = vmatpush3.bf16.msra.mxu1 %v5254_v49 }
  0x5a   : > { %4129 = vmatprep.subr.bf16.mxu1 %v5168_v5 }
  0x5c   : > { %845 = vmatmul.mubr.bf16.vlgmr.msra.gmra.mrb[16].mxu1 %v4888_v3 }
  0x5d   : > { %4130 = vmatpush3.bf16.msra.mxu1 %v5173_v9  ;;  %852 = vmatprep.mubr.bf16.mxu1 %v4893_v4 }
  0x5e   : > { %4131 = vmatprep.subr.bf16.mxu1 %v5175_v10 }
  0x61   : > { %4132 = vmatpush3.bf16.msra.mxu1 %v5184_v15 }
  0x62   : > { %4133 = vmatprep.subr.bf16.mxu1 %v5188_v16 }
  0x64   : > { %853 = vmatmul.mubr.bf16.gmra.mrb[20].mxu1 %v4896_v6 }
  0x65   : > { %4134 = vmatpush3.bf16.msra.mxu1 %v5196_v21  ;;  %860 = vmatprep.mubr.bf16.mxu1 %v4897_v7 }
  0x66   : > { %4135 = vmatprep.subr.bf16.mxu1 %v5200_v22 }
  0x69   : > { %4136 = vmatpush3.bf16.msra.mxu1 %v5208_v27 }
  0x6a   : > { %4137 = vmatprep.subr.bf16.mxu1 %v5212_v28 }
  0x6c   : > { %861 = vmatmul.mubr.bf16.gmra.mrb[24].mxu1 %v4899_v11 }
  0x6d   : > { %4138 = vmatpush3.bf16.msra.mxu1 %v5220_v33  ;;  %868 = vmatprep.mubr.bf16.mxu1 %v3777_v12 }
  0x6e   : > { %4139 = vmatprep.subr.bf16.mxu1 %v5224_v34 }
  0x71   : > { %4140 = vmatpush3.bf16.msra.mxu1 %v5232_v39 }
  0x72   : > { %4141 = vmatprep.subr.bf16.mxu1 %v5236_v40 }
  0x74   : > { %869 = vmatmul.mubr.bf16.gmra.mrb[28].mxu1 %v3776_v13  ;;  %v4933_v13 = vld [vmem:[%s6087_s1 + $0x174] ss:$8 sps:$4 sm:$0xff]  }
  0x75   : > { %4142 = vmatpush3.bf16.msra.mxu1 %v5244_v45  ;;  %1045 = vmatprep.mubr.bf16.mxu1 %v4904_v14 }
  0x76   : > { %4143 = vmatprep.subr.bf16.mxu1 %v5248_v46 }
  0x79   : > { %4144 = vmatpush3.bf16.msra.mxu1 %v5254_v49 }
  0x7a   : > { %4174 = vmatprep.subr.bf16.mxu1 %v5168_v5 }
  0x7c   : > { %1046 = vmatmul.mubr.bf16.vlgmr.msra.gmra.mrb[32].mxu1 %v4902_v17 }
  0x7d   : > { %4175 = vmatpush3.bf16.msra.mxu1 %v5173_v9  ;;  %1053 = vmatprep.mubr.bf16.mxu1 %v4905_v18  ;;  %v4935_v18 = vld [vmem:[%s6087_s1 + $0x170] ss:$8 sps:$4 sm:$0xff]  }
  0x7e   : > { %4176 = vmatprep.subr.bf16.mxu1 %v5175_v10 }
  0x81   : > { %4177 = vmatpush3.bf16.msra.mxu1 %v5184_v15 }
  0x82   : > { %4178 = vmatprep.subr.bf16.mxu1 %v5188_v16 }
  0x84   : > { %1054 = vmatmul.mubr.bf16.gmra.mrb[36].mxu1 %v4907_v19 }
  0x85   : > { %4179 = vmatpush3.bf16.msra.mxu1 %v5196_v21  ;;  %1061 = vmatprep.mubr.bf16.mxu1 %v4908_v20 }
  0x86   : > { %4180 = vmatprep.subr.bf16.mxu1 %v5200_v22 }
  0x89   : > { %4181 = vmatpush3.bf16.msra.mxu1 %v5208_v27 }
  0x8a   : > { %4182 = vmatprep.subr.bf16.mxu1 %v5212_v28 }
  0x8c   : > { %1062 = vmatmul.mubr.bf16.gmra.mrb[40].mxu1 %v4910_v24 }
  0x8d   : > { %4183 = vmatpush3.bf16.msra.mxu1 %v5220_v33  ;;  %1069 = vmatprep.mubr.bf16.mxu1 %v3797_v25  ;;  %v701_v25 = vsel %vm620_vm0, %v491_v44, 0 }
  0x8e   : > { %4184 = vmatprep.subr.bf16.mxu1 %v5224_v34 }
  0x91   : > { %4185 = vmatpush3.bf16.msra.mxu1 %v5232_v39 }
  0x92   : > { %4186 = vmatprep.subr.bf16.mxu1 %v5236_v40 }
  0x94   : > { %1070 = vmatmul.mubr.bf16.gmra.mrb[44].mxu1 %v3796_v26  ;;  %v3778_v26 = vld [vmem:[%s6088_s2 + $0x4] sm:$0x3] }
  0x95   : > { %4187 = vmatpush3.bf16.msra.mxu1 %v5244_v45  ;;  %1246 = vmatprep.mubr.bf16.mxu1 %v4915_v29 }
  0x96   : > { %4188 = vmatprep.subr.bf16.mxu1 %v5248_v46 }
  0x99   : > { %4189 = vmatpush3.bf16.msra.mxu1 %v5254_v49 }
  0x9a   : > { %4264 = vmatprep.subr.bf16.mxu1 %v5168_v5 }
  0x9c   : > { %1247 = vmatmul.mubr.bf16.vlgmr.msra.gmra.mrb[48].mxu1 %v4913_v30 }
  0x9d   : > { %1254 = vmatprep.mubr.bf16.mxu1 %v4916_v31  ;;  %4265 = vmatpush3.bf16.msra.mxu1 %v5173_v9 }
  0x9e   : > { %4266 = vmatprep.subr.bf16.mxu1 %v5175_v10 }
  0xa1   : > { %4267 = vmatpush3.bf16.msra.mxu1 %v5184_v15 }
  0xa2   : > { %4268 = vmatprep.subr.bf16.mxu1 %v5188_v16 }
  0xa4   : > { %1255 = vmatmul.mubr.bf16.gmra.mrb[52].mxu1 %v4918_v36 }
  0xa5   : > { %1262 = vmatprep.mubr.bf16.mxu1 %v4919_v37  ;;  %4269 = vmatpush3.bf16.msra.mxu1 %v5196_v21 }
  0xa6   : > { %4270 = vmatprep.subr.bf16.mxu1 %v5200_v22 }
  0xa9   : > { %4271 = vmatpush3.bf16.msra.mxu1 %v5208_v27 }
  0xaa   : > { %4272 = vmatprep.subr.bf16.mxu1 %v5212_v28 }
  0xac   : > { %1263 = vmatmul.mubr.bf16.gmra.mrb[56].mxu1 %v4921_v41 }
  0xad   : > { %1270 = vmatprep.mubr.bf16.mxu1 %v3817_v42  ;;  %4273 = vmatpush3.bf16.msra.mxu1 %v5220_v33  ;;  %v3857_v42 = vcombine.high %v3849_v35, %v3849_v35 }
  0xae   : > { %4274 = vmatprep.subr.bf16.mxu1 %v5224_v34 }
  0xb1   : > { %4275 = vmatpush3.bf16.msra.mxu1 %v5232_v39 }
  0xb2   : > { %4276 = vmatprep.subr.bf16.mxu1 %v5236_v40 }
  0xb4   : > { %1271 = vmatmul.mubr.bf16.gmra.mrb[60].mxu1 %v3816_v43 }
  0xb5   : > { %4277 = vmatpush3.bf16.msra.mxu1 %v5244_v45  ;;  %1648 = vmatprep.mubr.bf16.mxu1 %v4926_v47  ;;  %v3856_v47 = vcombine.low %v3849_v35, %v3849_v35 }
  0xb6   : > { %4278 = vmatprep.subr.bf16.mxu1 %v5248_v46 }
  0xb9   : > { %4279 = vmatpush3.bf16.msra.mxu1 %v5254_v49 }
  0xba   : > { %4309 = vmatprep.subr.bf16.mxu1 %v5168_v5 }
  0xbc   : > { %1649 = vmatmul.mubr.bf16.vlgmr.msra.gmra.mrb[64].mxu1 %v4924_v48 }
  0xbd   : > { %4310 = vmatpush3.bf16.msra.mxu1 %v5173_v9  ;;  %1656 = vmatprep.mubr.bf16.mxu1 %v4927_v58  ;;  %v4943_v58 = vld [vmem:[%s6087_s1 + $0x188] ss:$8 sps:$4 sm:$0xff]  }
  0xbe   : > { %4311 = vmatprep.subr.bf16.mxu1 %v5175_v10 }
  0xc1   : > { %4312 = vmatpush3.bf16.msra.mxu1 %v5184_v15 }
  0xc2   : > { %4313 = vmatprep.subr.bf16.mxu1 %v5188_v16 }
  0xc4   : > { %1657 = vmatmul.mubr.bf16.gmra.mrb[68].mxu1 %v4929_v61 }
  0xc5   : > { %4314 = vmatpush3.bf16.msra.mxu1 %v5196_v21  ;;  %1664 = vmatprep.mubr.bf16.mxu1 %v4933_v13 }
  0xc6   : > { %4315 = vmatprep.subr.bf16.mxu1 %v5200_v22 }
  0xc9   : > { %4316 = vmatpush3.bf16.msra.mxu1 %v5208_v27 }
  0xca   : > { %4317 = vmatprep.subr.bf16.mxu1 %v5212_v28 }
  0xcc   : > { %1665 = vmatmul.mubr.bf16.gmra.mrb[72].mxu1 %v4935_v18 }
  0xcd   : > { %4318 = vmatpush3.bf16.msra.mxu1 %v5220_v33  ;;  %1672 = vmatprep.mubr.bf16.mxu1 %v3857_v42 }
  0xce   : > { %4319 = vmatprep.subr.bf16.mxu1 %v5224_v34 }
  0xd1   : > { %4320 = vmatpush3.bf16.msra.mxu1 %v5232_v39 }
  0xd2   : > { %4321 = vmatprep.subr.bf16.mxu1 %v5236_v40 }
  0xd4   : > { %1673 = vmatmul.mubr.bf16.gmra.mrb[76].mxu1 %v3856_v47 }
  0xd5   : > { %4322 = vmatpush3.bf16.msra.mxu1 %v5244_v45 }
  0xd6   : > { %4323 = vmatprep.subr.bf16.mxu1 %v5248_v46 }
  0xd9   : > { %4324 = vmatpush3.bf16.msra.mxu1 %v5254_v49 }
  0xda   : > { %4354 = vmatprep.subr.bf16.mxu1 %v5168_v5 }
 0x10f   : > { %v4050_v50 = vpop.f32.mrb[0].mxu1  ;;  %v4010_v51 = vpop.f32.mrb[0].mxu0 }
 0x110   : > { %v4051_v52 = vpop.f32.mrb[1].mxu1  ;;  %v4011_v53 = vpop.f32.mrb[1].mxu0 }
 0x111   : > { %v4052_v54 = vadd.f32 %v4051_v52, %v4050_v50  ;;  %v4053_v55 = vpop.f32.mrb[2].mxu1  ;;  %v5442_v56 = vadd.f32 %v4011_v53, %v4010_v51  ;;  %v4013_v57 = vpop.f32.mrb[2].mxu0 }
 0x112   : > { %v4054_v59 = vpop.f32.mrb[3].mxu1  ;;  %v4014_v60 = vpop.f32.mrb[3].mxu0 }
 0x113   : > { %v4055_v62 = vadd.f32 %v4054_v59, %v4053_v55  ;;  %v5452_v63 = vadd.f32 %v4014_v60, %v4013_v57  ;;  %v4945_v59 = vld [vmem:[%s6087_s1 + $0x18c] ss:$8 sps:$4 sm:$0xff]  }
 0x114   : > { %1849 = vmatprep.mubr.bf16.mxu1 %v4945_v59 }
 0x115   : > { %v601_v0 = vpack.c.bf16 %v4055_v62, %v4052_v54  ;;  %v487_v1 = vpack.c.bf16 %v5452_v63, %v5442_v56  ;;  %1850 = vmatmul.mubr.bf16.vlgmr.msra.gmra.mrb[80].mxu1 %v4943_v58  ;;  %v4951_v56 = vld [vmem:[%s6087_s1 + $0x198] ss:$8 sps:$4 sm:$0xff]   ;;  %v4960_v58 = vld [vmem:[%s6087_s1 + $0x1d4] ss:$8 sps:$4 sm:$0xff]  }
 0x116   : > { %4355 = vmatpush3.bf16.msra.mxu1 %v5173_v9 }
 0x117   : > { %v4056_v2 = vpop.f32.mrb[4].mxu1  ;;  %4482 = vmatprep.mubr.msk.bf16.mxu0 %vm607_vm1, %v601_v0  ;;  %v4016_v3 = vpop.f32.mrb[4].mxu0  ;;  %4356 = vmatprep.subr.bf16.mxu1 %v5175_v10 }
 0x118   : > { %v4057_v4 = vpop.f32.mrb[5].mxu1  ;;  %v4017_v6 = vpop.f32.mrb[5].mxu0 }
 0x119   : > { %v4058_v7 = vadd.f32 %v4057_v4, %v4056_v2  ;;  %v4059_v8 = vpop.f32.mrb[6].mxu1  ;;  %v5459_v11 = vadd.f32 %v4017_v6, %v4016_v3  ;;  %v4019_v12 = vpop.f32.mrb[6].mxu0 }
 0x11a   : > { %v4060_v14 = vpop.f32.mrb[7].mxu1  ;;  %v4020_v17 = vpop.f32.mrb[7].mxu0  ;;  %4357 = vmatpush3.bf16.msra.mxu1 %v5184_v15 }
 0x11b   : > { %v4061_v19 = vadd.f32 %v4060_v14, %v4059_v8  ;;  %v5469_v20 = vadd.f32 %v4020_v17, %v4019_v12  ;;  %v4948_v8 = vld [vmem:[%s6087_s1 + $0x19c] ss:$8 sps:$4 sm:$0xff]   ;;  %4358 = vmatprep.subr.bf16.mxu1 %v5188_v16 }
 0x11c   : > { %1857 = vmatprep.mubr.bf16.mxu1 %v4948_v8  ;;  %v3798_v17 = vld [vmem:[%s6088_s2 + $0x6] sm:$0x3] }
 0x11d   : > { %v602_v23 = vpack.c.bf16 %v4061_v19, %v4058_v7  ;;  %v488_v24 = vpack.c.bf16 %v5469_v20, %v5459_v11  ;;  %1858 = vmatmul.mubr.bf16.gmra.mrb[84].mxu1 %v4951_v56  ;;  %v4954_v11 = vld [vmem:[%s6087_s1 + $0x1a8] ss:$8 sps:$4 sm:$0xff]   ;;  %v3869_v20 = vld [vmem:[%s6087_s1 + $0x1b8] sm:$0x11]  ;;  %v1096_v47 = vsel %vm620_vm0, %v3798_v17, 0 }
 0x11e   : > { %4359 = vmatpush3.bf16.msra.mxu1 %v5196_v21  ;;  %v4965_v56 = vld [vmem:[%s6087_s1 + $0x1e0] ss:$8 sps:$4 sm:$0xff]  }
 0x11f   : > { %v4062_v29 = vpop.f32.mrb[8].mxu1  ;;  %4483 = vmatmul.mubr.msk.bf16.vlgmr.msra.gmra.mrb[16].mxu0 %vm607_vm1, %v602_v23  ;;  %v4022_v30 = vpop.f32.mrb[8].mxu0  ;;  %4360 = vmatprep.subr.bf16.mxu1 %v5200_v22  ;;  %v4952_v23 = vld [vmem:[%s6087_s1 + $0x1ac] ss:$8 sps:$4 sm:$0xff]  }
 0x120   : > { %v4063_v31 = vpop.f32.mrb[9].mxu1  ;;  %4491 = vmatpush3.bf16.msra.mxu0 %v701_v25  ;;  %v4023_v32 = vpop.f32.mrb[9].mxu0  ;;  %1865 = vmatprep.mubr.bf16.mxu1 %v4952_v23 }
 0x121   : > { %v4064_v36 = vadd.f32 %v4063_v31, %v4062_v29  ;;  %v4065_v37 = vpop.f32.mrb[10].mxu1  ;;  %v4024_v38 = vadd.f32 %v4023_v32, %v4022_v30  ;;  %v4025_v41 = vpop.f32.mrb[10].mxu0  ;;  %4820 = vmatprep.subr.msk.bf16.mxu0 %vm620_vm0, %v3778_v26  ;;  %v3877_v32 = vcombine.high %v3869_v20, %v3869_v20 }
 0x122   : > { %v4066_v43 = vpop.f32.mrb[11].mxu1  ;;  %v4026_v44 = vpop.f32.mrb[11].mxu0  ;;  %4361 = vmatpush3.bf16.msra.mxu1 %v5208_v27 }
 0x123   : > { %v4067_v48 = vadd.f32 %v4066_v43, %v4065_v37  ;;  %v4027_v50 = vadd.f32 %v4026_v44, %v4025_v41  ;;  %4362 = vmatprep.subr.bf16.mxu1 %v5212_v28 }
 0x125   : > { %v603_v51 = vpack.c.bf16 %v4067_v48, %v4064_v36  ;;  %v489_v52 = vpack.c.bf16 %v4027_v50, %v4024_v38  ;;  %1866 = vmatmul.mubr.bf16.gmra.mrb[88].mxu1 %v4954_v11  ;;  %v3876_v38 = vcombine.low %v3869_v20, %v3869_v20  ;;  %v3818_v48 = vld [vmem:[%s6088_s2 + $0x8] sm:$0x3]  ;;  %v4959_v50 = vld [vmem:[%s6087_s1 + $0x1c4] ss:$8 sps:$4 sm:$0xff]  }
 0x126   : > { %4363 = vmatpush3.bf16.msra.mxu1 %v5220_v33  ;;  %1873 = vmatprep.mubr.bf16.mxu1 %v3877_v32 }
 0x127   : > { %v4068_v53 = vpop.f32.mrb[12].mxu1  ;;  %4486 = vmatprep.mubr.msk.bf16.mxu0 %vm607_vm1, %v603_v51  ;;  %v4028_v54 = vpop.f32.mrb[12].mxu0  ;;  %4364 = vmatprep.subr.bf16.mxu1 %v5224_v34 }
 0x128   : > { %v4069_v55 = vpop.f32.mrb[13].mxu1  ;;  %v4029_v57 = vpop.f32.mrb[13].mxu0 }
 0x129   : > { %v4070_v60 = vadd.f32 %v4069_v55, %v4068_v53  ;;  %v4071_v61 = vpop.f32.mrb[14].mxu1  ;;  %v4030_v62 = vadd.f32 %v4029_v57, %v4028_v54  ;;  %v4031_v0 = vpop.f32.mrb[14].mxu0  ;;  %v4957_v54 = vld [vmem:[%s6087_s1 + $0x1c0] ss:$8 sps:$4 sm:$0xff]  }
 0x12a   : > { %v4072_v2 = vpop.f32.mrb[15].mxu1  ;;  %v4032_v3 = vpop.f32.mrb[15].mxu0  ;;  %4365 = vmatpush3.bf16.msra.mxu1 %v5232_v39  ;;  %v4962_v0 = vld [vmem:[%s6087_s1 + $0x1d0] ss:$8 sps:$4 sm:$0xff]  }
 0x12b   : > { %v604_v4 = vpack.c.bf16 %v4070_v60, %v4070_v60  ;;  %4366 = vmatprep.subr.bf16.mxu1 %v5236_v40 }
 0x12d   : > { %4487 = vmatmul.mubr.msk.bf16.gmra.mrb[20].mxu0 %vm607_vm1, %v604_v4  ;;  %1874 = vmatmul.mubr.bf16.gmra.mrb[92].mxu1 %v3876_v38  ;;  %v4963_v4 = vld [vmem:[%s6087_s1 + $0x1e4] ss:$8 sps:$4 sm:$0xff]  }
 0x12e   : > { %4492 = vmatprep.mubr.msk.bf16.mxu0 %vm607_vm1, %v487_v1  ;;  %v895_v1 = vsel %vm620_vm0, %v3778_v26, 0  ;;  %4367 = vmatpush3.bf16.msra.mxu1 %v5244_v45 }
 0x12f   : > { %v4100_v6 = vpop.f32.mrb[16].mxu1  ;;  %4368 = vmatprep.subr.bf16.mxu1 %v5248_v46  ;;  %2050 = vmatprep.mubr.bf16.mxu1 %v4959_v50 }
 0x130   : > { %v4101_v7 = vpop.f32.mrb[17].mxu1 }
 0x131   : > { %v4102_v12 = vadd.f32 %v4101_v7, %v4100_v6  ;;  %v4103_v13 = vpop.f32.mrb[18].mxu1 }
 0x132   : > { %v4104_v14 = vpop.f32.mrb[19].mxu1  ;;  %4369 = vmatpush3.bf16.msra.mxu1 %v5254_v49 }
 0x133   : > { %v4105_v63 = vadd.f32 %v4104_v14, %v4103_v13 }
 0x135   : > { %v876_v18 = vpack.c.bf16 %v4105_v63, %v4102_v12  ;;  %4493 = vmatmul.mubr.msk.bf16.vlgmr.msra.gmra.mrb[16].mxu0 %vm607_vm1, %v488_v24  ;;  %v490_v24 = vpack.c.bf16 %v4030_v62, %v4030_v62  ;;  %2051 = vmatmul.mubr.bf16.vlgmr.msra.gmra.mrb[96].mxu1 %v4957_v54  ;;  %v3889_v12 = vld [vmem:[%s6087_s1 + $0x1f0] sm:$0x11] }
 0x136   : > { %4496 = vmatprep.mubr.msk.bf16.mxu0 %vm607_vm1, %v489_v52  ;;  %4501 = vmatpush3.bf16.msra.mxu0 %v895_v1 }
 0x137   : > { %v4106_v19 = vpop.f32.mrb[20].mxu1  ;;  %4821 = vmatprep.subr.msk.bf16.mxu0 %vm620_vm0, %v3798_v17  ;;  %2058 = vmatprep.mubr.bf16.mxu1 %v4960_v58  ;;  %v3897_v17 = vcombine.high %v3889_v12, %v3889_v12 }
 0x138   : > { %v4107_v25 = vpop.f32.mrb[21].mxu1 }
 0x139   : > { %v4108_v26 = vadd.f32 %v4107_v25, %v4106_v19  ;;  %v4109_v29 = vpop.f32.mrb[22].mxu1  ;;  %v1297_v25 = vsel %vm620_vm0, %v3818_v48, 0 }
 0x13a   : > { %v4110_v30 = vpop.f32.mrb[23].mxu1 }
 0x13b   : > { %v4111_v31 = vadd.f32 %v4110_v30, %v4109_v29 }
 0x13d   : > { %v877_v35 = vpack.c.bf16 %v4111_v31, %v4108_v26  ;;  %4497 = vmatmul.mubr.msk.bf16.gmra.mrb[24].mxu0 %vm607_vm1, %v490_v24  ;;  %2059 = vmatmul.mubr.bf16.gmra.mrb[100].mxu1 %v4962_v0  ;;  %v3896_v24 = vcombine.low %v3889_v12, %v3889_v12  ;;  %v4932_v12 = vld [vmem:[%s6087_s1 + $0x11c] ss:$8 sps:$4 sm:$0xff]  }
 0x13e   : > { %4502 = vmatprep.mubr.msk.bf16.mxu0 %vm607_vm1, %v876_v18  ;;  %2066 = vmatprep.mubr.bf16.mxu1 %v4963_v4 }
 0x13f   : > { %v4112_v36 = vpop.f32.mrb[24].mxu1 }
 0x140   : > { %v4113_v37 = vpop.f32.mrb[25].mxu1 }
 0x141   : > { %v4114_v41 = vadd.f32 %v4113_v37, %v4112_v36  ;;  %v4115_v42 = vpop.f32.mrb[26].mxu1 }
 0x142   : > { %v4116_v43 = vpop.f32.mrb[27].mxu1 }
 0x143   : > { %v4117_v44 = vadd.f32 %v4116_v43, %v4115_v42 }
 0x145   : > { %v878_v51 = vpack.c.bf16 %v4117_v44, %v4114_v41  ;;  %4503 = vmatmul.mubr.msk.bf16.vlgmr.msra.gmra.mrb[16].mxu0 %vm607_vm1, %v877_v35  ;;  %2067 = vmatmul.mubr.bf16.gmra.mrb[104].mxu1 %v4965_v56 }
 0x146   : > { %4511 = vmatpush3.bf16.msra.mxu0 %v1096_v47  ;;  %2074 = vmatprep.mubr.bf16.mxu1 %v3897_v17 }
 0x147   : > { %v4118_v52 = vpop.f32.mrb[28].mxu1  ;;  %4506 = vmatprep.mubr.msk.bf16.mxu0 %vm607_vm1, %v878_v51  ;;  %4822 = vmatprep.subr.msk.bf16.mxu0 %vm620_vm0, %v3818_v48 }
 0x148   : > { %v4119_v53 = vpop.f32.mrb[29].mxu1 }
 0x149   : > { %v4120_v55 = vadd.f32 %v4119_v53, %v4118_v52  ;;  %v4121_v57 = vpop.f32.mrb[30].mxu1 }
 0x14a   : > { %v4122_v59 = vpop.f32.mrb[31].mxu1 }
 0x14b   : > { %v879_v60 = vpack.c.bf16 %v4120_v55, %v4120_v55 }
 0x14d   : > { %4507 = vmatmul.mubr.msk.bf16.gmra.mrb[28].mxu0 %vm607_vm1, %v879_v60  ;;  %2075 = vmatmul.mubr.bf16.gmra.mrb[108].mxu1 %v3896_v24 }
 0x14f   : > { %v4145_v61 = vpop.f32.mrb[32].mxu1 }
 0x150   : > { %v4146_v62 = vpop.f32.mrb[33].mxu1 }
 0x151   : > { %v4147_v2 = vadd.f32 %v4146_v62, %v4145_v61  ;;  %v4148_v3 = vpop.f32.mrb[34].mxu1 }
 0x152   : > { %v4149_v6 = vpop.f32.mrb[35].mxu1 }
 0x153   : > { %v4150_v7 = vadd.f32 %v4149_v6, %v4148_v3 }
 0x155   : > { %v1077_v8 = vpack.c.bf16 %v4150_v7, %v4147_v2 }
 0x157   : > { %v4151_v13 = vpop.f32.mrb[36].mxu1  ;;  %4512 = vmatprep.mubr.msk.bf16.mxu0 %vm607_vm1, %v1077_v8 }
 0x158   : > { %v4152_v14 = vpop.f32.mrb[37].mxu1 }
 0x159   : > { %v4153_v63 = vadd.f32 %v4152_v14, %v4151_v13  ;;  %v4154_v1 = vpop.f32.mrb[38].mxu1 }
 0x15a   : > { %v4155_v18 = vpop.f32.mrb[39].mxu1 }
 0x15b   : > { %v4156_v19 = vadd.f32 %v4155_v18, %v4154_v1 }
 0x15d   : > { %v1078_v23 = vpack.c.bf16 %v4156_v19, %v4153_v63 }
 0x15f   : > { %v4157_v11 = vpop.f32.mrb[40].mxu1  ;;  %4513 = vmatmul.mubr.msk.bf16.vlgmr.msra.gmra.mrb[16].mxu0 %vm607_vm1, %v1078_v23 }
 0x160   : > { %v4158_v20 = vpop.f32.mrb[41].mxu1  ;;  %4521 = vmatpush3.bf16.msra.mxu0 %v1297_v25 }
 0x161   : > { %v4159_v26 = vadd.f32 %v4158_v20, %v4157_v11  ;;  %v4160_v29 = vpop.f32.mrb[42].mxu1  ;;  %4219 = vmatprep.subr.bf16.mxu0 %v5168_v5 }
 0x162   : > { %v4161_v30 = vpop.f32.mrb[43].mxu1 }
 0x163   : > { %v4162_v31 = vadd.f32 %v4161_v30, %v4160_v29 }
 0x165   : > { %v1079_v32 = vpack.c.bf16 %v4162_v31, %v4159_v26 }
 0x167   : > { %v4163_v35 = vpop.f32.mrb[44].mxu1  ;;  %4516 = vmatprep.mubr.msk.bf16.mxu0 %vm607_vm1, %v1079_v32 }
 0x168   : > { %v4164_v36 = vpop.f32.mrb[45].mxu1 }
 0x169   : > { %v4165_v37 = vadd.f32 %v4164_v36, %v4163_v35  ;;  %v4166_v38 = vpop.f32.mrb[46].mxu1  ;;  %v3838_v35 = vld [vmem:[%s6088_s2 + $0xa] sm:$0x3] }
 0x16a   : > { %v4167_v41 = vpop.f32.mrb[47].mxu1 }
 0x16b   : > { %v1080_v42 = vpack.c.bf16 %v4165_v37, %v4165_v37  ;;  %v1498_v37 = vsel %vm620_vm0, %v3838_v35, 0 }
 0x16d   : > { %4517 = vmatmul.mubr.msk.bf16.gmra.mrb[32].mxu0 %vm607_vm1, %v1080_v42 }
 0x16f   : > { %v4190_v43 = vpop.f32.mrb[48].mxu1 }
 0x170   : > { %v4191_v44 = vpop.f32.mrb[49].mxu1 }
 0x171   : > { %v4192_v47 = vadd.f32 %v4191_v44, %v4190_v43  ;;  %v4193_v48 = vpop.f32.mrb[50].mxu1 }
 0x172   : > { %v4194_v50 = vpop.f32.mrb[51].mxu1 }
 0x173   : > { %v4195_v5 = vadd.f32 %v4194_v50, %v4193_v48 }
 0x175   : > { %v1278_v51 = vpack.c.bf16 %v4195_v5, %v4192_v47 }
 0x177   : > { %v4196_v52 = vpop.f32.mrb[52].mxu1  ;;  %4522 = vmatprep.mubr.msk.bf16.mxu0 %vm607_vm1, %v1278_v51 }
 0x178   : > { %v4197_v53 = vpop.f32.mrb[53].mxu1 }
 0x179   : > { %v4198_v54 = vadd.f32 %v4197_v53, %v4196_v52  ;;  %v4199_v55 = vpop.f32.mrb[54].mxu1 }
 0x17a   : > { %v4200_v57 = vpop.f32.mrb[55].mxu1 }
 0x17b   : > { %v4201_v58 = vadd.f32 %v4200_v57, %v4199_v55 }
 0x17d   : > { %v1279_v59 = vpack.c.bf16 %v4201_v58, %v4198_v54 }
 0x17f   : > { %4523 = vmatmul.mubr.msk.bf16.vlgmr.msra.gmra.mrb[16].mxu0 %vm607_vm1, %v1279_v59  ;;  %v4202_v60 = vpop.f32.mrb[56].mxu1 }
 0x180   : > { %4220 = vmatpush3.bf16.msra.mxu0 %v5173_v9  ;;  %v4203_v61 = vpop.f32.mrb[57].mxu1 }
 0x181   : > { %4221 = vmatprep.subr.bf16.mxu0 %v5175_v10  ;;  %v4204_v62 = vadd.f32 %v4203_v61, %v4202_v60  ;;  %v4205_v0 = vpop.f32.mrb[58].mxu1 }
 0x182   : > { %v4206_v2 = vpop.f32.mrb[59].mxu1 }
 0x183   : > { %v4207_v3 = vadd.f32 %v4206_v2, %v4205_v0 }
 0x184   : > { %4222 = vmatpush3.bf16.msra.mxu0 %v5184_v15  ;;  %v4930_v15 = vld [vmem:[%s6087_s1 + $0x118] ss:$8 sps:$4 sm:$0xff]  }
 0x185   : > { %v1280_v4 = vpack.c.bf16 %v4207_v3, %v4204_v62  ;;  %4223 = vmatprep.subr.bf16.mxu0 %v5188_v16  ;;  %v4936_v16 = vld [vmem:[%s6087_s1 + $0x12c] ss:$8 sps:$4 sm:$0xff]  }
 0x187   : > { %v4208_v6 = vpop.f32.mrb[60].mxu1  ;;  %4526 = vmatprep.mubr.msk.bf16.mxu0 %vm607_vm1, %v1280_v4 }
 0x188   : > { %4224 = vmatpush3.bf16.msra.mxu0 %v5196_v21  ;;  %v4209_v7 = vpop.f32.mrb[61].mxu1  ;;  %v4939_v21 = vld [vmem:[%s6087_s1 + $0x128] ss:$8 sps:$4 sm:$0xff]  }
 0x189   : > { %v4210_v8 = vadd.f32 %v4209_v7, %v4208_v6  ;;  %4225 = vmatprep.subr.bf16.mxu0 %v5200_v22  ;;  %v4211_v9 = vpop.f32.mrb[62].mxu1  ;;  %v4941_v22 = vld [vmem:[%s6087_s1 + $0x13c] ss:$8 sps:$4 sm:$0xff]  }
 0x18a   : > { %v4212_v10 = vpop.f32.mrb[63].mxu1 }
 0x18b   : > { %v1281_v13 = vpack.c.bf16 %v4210_v8, %v4210_v8  ;;  %v5659_v8 = vld [vmem:[%s6088_s2 + $0xc] sm:$0x3] }
 0x18c   : > { %4226 = vmatpush3.bf16.msra.mxu0 %v5208_v27  ;;  %v3829_v27 = vld [vmem:[%s6087_s1 + $0x148] sm:$0x11] }
 0x18d   : > { %4527 = vmatmul.mubr.msk.bf16.gmra.mrb[36].mxu0 %vm607_vm1, %v1281_v13  ;;  %4227 = vmatprep.subr.bf16.mxu0 %v5212_v28  ;;  %v4946_v28 = vld [vmem:[%s6087_s1 + $0x138] ss:$8 sps:$4 sm:$0xff]  }
 0x18e   : > { %1447 = vmatprep.mubr.bf16.mxu0 %v4932_v12 }
 0x190   : > { %4228 = vmatpush3.bf16.msra.mxu0 %v5220_v33  ;;  %v3837_v33 = vcombine.high %v3829_v27, %v3829_v27 }
 0x191   : > { %4229 = vmatprep.subr.bf16.mxu0 %v5224_v34  ;;  %v3836_v34 = vcombine.low %v3829_v27, %v3829_v27 }
 0x194   : > { %4230 = vmatpush3.bf16.msra.mxu0 %v5232_v39  ;;  %v4280_v39 = vpop.f32.mrb[64].mxu1 }
 0x195   : > { %4231 = vmatprep.subr.bf16.mxu0 %v5236_v40  ;;  %v4281_v40 = vpop.f32.mrb[65].mxu1 }
 0x198   : > { %4232 = vmatpush3.bf16.msra.mxu0 %v5244_v45  ;;  %v4283_v45 = vpop.f32.mrb[66].mxu1 }
 0x199   : > { %4233 = vmatprep.subr.bf16.mxu0 %v5248_v46  ;;  %v4284_v46 = vpop.f32.mrb[67].mxu1 }
 0x19a   : > { %v5621_v14 = vadd.f32 %v4284_v46, %v4283_v45  ;;  %v4286_v63 = vpop.f32.mrb[68].mxu1 }
 0x19b   : > { %v4287_v1 = vpop.f32.mrb[69].mxu1 }
 0x19c   : > { %4234 = vmatpush3.bf16.msra.mxu0 %v5254_v49  ;;  %v5619_v49 = vadd.f32 %v4281_v40, %v4280_v39  ;;  %v5625_v17 = vadd.f32 %v4287_v1, %v4286_v63  ;;  %v4289_v18 = vpop.f32.mrb[70].mxu1 }
 0x19d   : > { %v4290_v19 = vpop.f32.mrb[71].mxu1  ;;  %4823 = vmatprep.subr.msk.bf16.mxu0 %vm620_vm0, %v3838_v35 }
 0x19e   : > { %v1680_v56 = vpack.c.bf16 %v5621_v14, %v5619_v49  ;;  %v5627_v23 = vadd.f32 %v4290_v19, %v4289_v18 }
 0x19f   : > { %1448 = vmatmul.mubr.bf16.vlgmr.msra.gmra.mrb[40].mxu0 %v4930_v15  ;;  %v4292_v11 = vpop.f32.mrb[72].mxu1 }
 0x1a0   : > { %1455 = vmatprep.mubr.bf16.mxu0 %v4936_v16  ;;  %v1681_v25 = vpack.c.bf16 %v5627_v23, %v5625_v17  ;;  %v4293_v20 = vpop.f32.mrb[73].mxu1  ;;  %4531 = vmatpush3.bf16.msra.mxu0 %v1498_v37  ;;  %v5050_v23 = vmov 0.0  }
 0x1a1   : > { %v4295_v24 = vpop.f32.mrb[74].mxu1  ;;  %v5631_v29 = vadd.f32 %v4293_v20, %v4292_v11  ;;  %4824 = vmatprep.subr.msk.bf16.mxu0 %vm620_vm0, %v5659_v8  ;;  %4582 = vmatprep.subr.bf16.mxu1 %v5050_v23 }
 0x1a2   : > { %v4296_v26 = vpop.f32.mrb[75].mxu1  ;;  %4590 = vmatprep.mubr.msk.bf16.mxu1 %vm5051_vm2, %v5050_v23 }
 0x1a3   : > { %v5633_v30 = vadd.f32 %v4296_v26, %v4295_v24 }
 0x1a5   : > { %v1682_v31 = vpack.c.bf16 %v5633_v30, %v5631_v29 }
 0x1a7   : > { %1456 = vmatmul.mubr.bf16.gmra.mrb[44].mxu0 %v4939_v21  ;;  %v4298_v32 = vpop.f32.mrb[76].mxu1 }
 0x1a8   : > { %1463 = vmatprep.mubr.bf16.mxu0 %v4941_v22  ;;  %v4299_v36 = vpop.f32.mrb[77].mxu1 }
 0x1a9   : > { %v4301_v38 = vpop.f32.mrb[78].mxu1  ;;  %v5642_v42 = vadd.f32 %v4299_v36, %v4298_v32 }
 0x1aa   : > { %v4302_v41 = vpop.f32.mrb[79].mxu1 }
 0x1ab   : > { %v1683_v49 = vpack.c.bf16 %v5642_v42, %v5642_v42 }
 0x1af   : > { %1464 = vmatmul.mubr.bf16.gmra.mrb[48].mxu0 %v4946_v28 }
 0x1b0   : > { %1471 = vmatprep.mubr.bf16.mxu0 %v3837_v33 }
 0x1b7   : > { %1472 = vmatmul.mubr.bf16.gmra.mrb[52].mxu0 %v3836_v34 }
 0x1e8   : > { %v4325_v43 = vpop.f32.mrb[80].mxu1 }
 0x1e9   : > { %v4326_v47 = vpop.f32.mrb[81].mxu1 }
 0x1ea   : > { %v4328_v50 = vpop.f32.mrb[82].mxu1  ;;  %v5644_v53 = vadd.f32 %v4326_v47, %v4325_v43 }
 0x1eb   : > { %v4329_v51 = vpop.f32.mrb[83].mxu1 }
 0x1ec   : > { %v5646_v54 = vadd.f32 %v4329_v51, %v4328_v50 }
 0x1ee   : > { %v1881_v55 = vpack.c.bf16 %v5646_v54, %v5644_v53 }
 0x1f0   : > { %v4331_v57 = vpop.f32.mrb[84].mxu1 }
 0x1f1   : > { %v4332_v58 = vpop.f32.mrb[85].mxu1 }
 0x1f2   : > { %v4334_v59 = vpop.f32.mrb[86].mxu1  ;;  %v5650_v61 = vadd.f32 %v4332_v58, %v4331_v57 }
 0x1f3   : > { %v4335_v60 = vpop.f32.mrb[87].mxu1 }
 0x1f4   : > { %v5652_v62 = vadd.f32 %v4335_v60, %v4334_v59 }
 0x1f6   : > { %v1882_v0 = vpack.c.bf16 %v5652_v62, %v5650_v61 }
 0x1f8   : > { %v4337_v2 = vpop.f32.mrb[88].mxu1 }
 0x1f9   : > { %v4338_v4 = vpop.f32.mrb[89].mxu1 }
 0x1fa   : > { %v5661_v9 = vadd.f32 %v4338_v4, %v4337_v2  ;;  %v4340_v10 = vpop.f32.mrb[90].mxu1 }
 0x1fb   : > { %v4341_v15 = vpop.f32.mrb[91].mxu1 }
 0x1fc   : > { %v5665_v21 = vadd.f32 %v4341_v15, %v4340_v10 }
 0x1fe   : > { %v1883_v27 = vpack.c.bf16 %v5665_v21, %v5661_v9 }
 0x200   : > { %v4488_v44 = vpop.f32.mrb[20].mxu0  ;;  %v4343_v28 = vpop.f32.mrb[92].mxu1 }
 0x201   : > { %v674_v48 = vpop.f32.mrb[21].mxu0  ;;  %v4344_v33 = vpop.f32.mrb[93].mxu1 }
 0x202   : > { %v4489_v5 = vpop.f32.mrb[22].mxu0  ;;  %v5669_v34 = vadd.f32 %v4344_v33, %v4343_v28  ;;  %v4346_v39 = vpop.f32.mrb[94].mxu1 }
 0x203   : > { %v677_v52 = vpop.f32.mrb[23].mxu0  ;;  %v4347_v40 = vpop.f32.mrb[95].mxu1 }
 0x208   : > { %v4370_v45 = vpop.f32.mrb[96].mxu1 }
 0x209   : > { %v4371_v63 = vpop.f32.mrb[97].mxu1 }
 0x20a   : > { %v5671_v19 = vadd.f32 %v4371_v63, %v4370_v45  ;;  %v4373_v11 = vpop.f32.mrb[98].mxu1 }
 0x20b   : > { %v4374_v26 = vpop.f32.mrb[99].mxu1 }
 0x20c   : > { %v5673_v35 = vadd.f32 %v4374_v26, %v4373_v11 }
 0x20e   : > { %v2082_v37 = vpack.c.bf16 %v5673_v35, %v5671_v19 }
 0x210   : > { %v4498_v3 = vpop.f32.mrb[24].mxu0  ;;  %v4376_v38 = vpop.f32.mrb[100].mxu1 }
 0x211   : > { %v762_v6 = vadd.f32 %v4498_v3, %v4488_v44  ;;  %v753_v7 = vpop.f32.mrb[25].mxu0  ;;  %v4377_v41 = vpop.f32.mrb[101].mxu1 }
 0x212   : > { %v754_v12 = vadd.f32 %v753_v7, %v674_v48  ;;  %v4499_v13 = vpop.f32.mrb[26].mxu0  ;;  %v5677_v43 = vadd.f32 %v4377_v41, %v4376_v38  ;;  %v4379_v44 = vpop.f32.mrb[102].mxu1 }
 0x213   : > { %v756_v16 = vpop.f32.mrb[27].mxu0  ;;  %v4380_v47 = vpop.f32.mrb[103].mxu1 }
 0x214   : > { %v757_v22 = vadd.f32 %v756_v16, %v677_v52  ;;  %v5679_v48 = vadd.f32 %v4380_v47, %v4379_v44 }
 0x216   : > { %v2083_v50 = vpack.c.bf16 %v5679_v48, %v5677_v43 }
 0x218   : > { %v4382_v5 = vpop.f32.mrb[104].mxu1 }
 0x219   : > { %v4383_v51 = vpop.f32.mrb[105].mxu1 }
 0x21a   : > { %v5683_v52 = vadd.f32 %v4383_v51, %v4382_v5  ;;  %v4385_v57 = vpop.f32.mrb[106].mxu1 }
 0x21b   : > { %v4386_v58 = vpop.f32.mrb[107].mxu1 }
 0x21c   : > { %v5685_v59 = vadd.f32 %v4386_v58, %v4385_v57  ;;  %v1699_v58 = vsel %vm620_vm0, %v5659_v8, 0 }
 0x21e   : > { %v2084_v60 = vpack.c.bf16 %v5685_v59, %v5683_v52  ;;  %v3903_v52 = vld [vmem:[%s6089_s3] ss:$0 sm:$0xff] }
 0x220   : > { %v4508_v46 = vpop.f32.mrb[28].mxu0  ;;  %v4388_v2 = vpop.f32.mrb[108].mxu1 }
 0x221   : > { %v967_v1 = vadd.f32 %v4508_v46, %v762_v6  ;;  %v947_v18 = vpop.f32.mrb[29].mxu0  ;;  %v4389_v3 = vpop.f32.mrb[109].mxu1 }
 0x222   : > { %v965_v20 = vadd.f32 %v947_v18, %v754_v12  ;;  %v4509_v24 = vpop.f32.mrb[30].mxu0  ;;  %v5689_v4 = vadd.f32 %v4389_v3, %v4388_v2  ;;  %v4391_v6 = vpop.f32.mrb[110].mxu1  ;;  %v3878_v2 = vld [vmem:[%s6088_s2 + $0xe] sm:$0x3] }
 0x223   : > { %v950_v32 = vpop.f32.mrb[31].mxu0  ;;  %v4392_v7 = vpop.f32.mrb[111].mxu1 }
 0x224   : > { %v966_v36 = vadd.f32 %v950_v32, %v757_v22  ;;  %v2085_v17 = vpack.c.bf16 %v5689_v4, %v5689_v4 }
 0x240   : > { %v4518_v10 = vpop.f32.mrb[32].mxu0 }
 0x241   : > { %v1168_v12 = vadd.f32 %v4518_v10, %v967_v1  ;;  %v1148_v13 = vpop.f32.mrb[33].mxu0 }
 0x242   : > { %v1166_v15 = vadd.f32 %v1148_v13, %v965_v20  ;;  %v4519_v16 = vpop.f32.mrb[34].mxu0 }
 0x243   : > { %v1151_v22 = vpop.f32.mrb[35].mxu0 }
 0x244   : > { %v1167_v28 = vadd.f32 %v1151_v22, %v966_v36 }
 0x260   : > { %v4528_v33 = vpop.f32.mrb[36].mxu0 }
 0x261   : > { %v5691_v39 = vadd.f32 %v4528_v33, %v1168_v12  ;;  %v1349_v40 = vpop.f32.mrb[37].mxu0 }
 0x262   : > { %v5693_v45 = vadd.f32 %v1349_v40, %v1166_v15  ;;  %v4529_v46 = vpop.f32.mrb[38].mxu0 }
 0x263   : > { %v1352_v63 = vpop.f32.mrb[39].mxu0  ;;  %v1900_v46 = vsel %vm620_vm0, %v3878_v2, 0 }
 0x264   : > { %v5695_v18 = vadd.f32 %v1352_v63, %v1167_v28  ;;  %v3898_v63 = vld [vmem:[%s6088_s2 + $0x10] sm:$0x3] }
 0x265   : > { %v2101_v14 = vsel %vm620_vm0, %v3898_v63, 0 }
 0x272   : > { %v4235_v11 = vpop.f32.mrb[40].mxu0 }
 0x273   : > { %v4236_v24 = vpop.f32.mrb[41].mxu0 }
 0x274   : > { %v4237_v26 = vadd.f32 %v4236_v24, %v4235_v11  ;;  %v4238_v32 = vpop.f32.mrb[42].mxu0 }
 0x275   : > { %v4239_v1 = vpop.f32.mrb[43].mxu0 }
 0x276   : > { %v4240_v38 = vadd.f32 %v4239_v1, %v4238_v32 }
 0x278   : > { %v1479_v20 = vpack.c.bf16 %v4240_v38, %v4237_v26 }
 0x27a   : > { %v4241_v41 = vpop.f32.mrb[44].mxu0  ;;  %4532 = vmatprep.mubr.msk.bf16.mxu0 %vm607_vm1, %v1479_v20 }
 0x27b   : > { %v4242_v36 = vpop.f32.mrb[45].mxu0 }
 0x27c   : > { %v4243_v44 = vadd.f32 %v4242_v36, %v4241_v41  ;;  %v4244_v47 = vpop.f32.mrb[46].mxu0 }
 0x27d   : > { %v4245_v5 = vpop.f32.mrb[47].mxu0 }
 0x27e   : > { %v4246_v51 = vadd.f32 %v4245_v5, %v4244_v47 }
 0x280   : > { %v1480_v57 = vpack.c.bf16 %v4246_v51, %v4243_v44 }
 0x282   : > { %v4247_v3 = vpop.f32.mrb[48].mxu0  ;;  %4533 = vmatmul.mubr.msk.bf16.vlgmr.msra.gmra.mrb[16].mxu0 %vm607_vm1, %v1480_v57 }
 0x283   : > { %v4248_v6 = vpop.f32.mrb[49].mxu0  ;;  %4541 = vmatpush3.bf16.msra.mxu0 %v1699_v58 }
 0x284   : > { %v4249_v7 = vadd.f32 %v4248_v6, %v4247_v3  ;;  %v4250_v10 = vpop.f32.mrb[50].mxu0  ;;  %4825 = vmatprep.subr.msk.bf16.mxu0 %vm620_vm0, %v3878_v2 }
 0x285   : > { %v4251_v12 = vpop.f32.mrb[51].mxu0 }
 0x286   : > { %v4252_v13 = vadd.f32 %v4251_v12, %v4250_v10 }
 0x288   : > { %v1481_v15 = vpack.c.bf16 %v4252_v13, %v4249_v7 }
 0x28a   : > { %v4253_v16 = vpop.f32.mrb[52].mxu0  ;;  %4536 = vmatprep.mubr.msk.bf16.mxu0 %vm607_vm1, %v1481_v15 }
 0x28b   : > { %v4254_v8 = vpop.f32.mrb[53].mxu0 }
 0x28c   : > { %v4255_v22 = vadd.f32 %v4254_v8, %v4253_v16  ;;  %v4256_v28 = vpop.f32.mrb[54].mxu0 }
 0x28d   : > { %v4257_v33 = vpop.f32.mrb[55].mxu0 }
 0x28e   : > { %v1482_v40 = vpack.c.bf16 %v4255_v22, %v4255_v22 }
 0x290   : > { %4537 = vmatmul.mubr.msk.bf16.gmra.mrb[56].mxu0 %vm607_vm1, %v1482_v40 }
 0x291   : > { %4542 = vmatprep.mubr.msk.bf16.mxu0 %vm607_vm1, %v1680_v56  ;;  %v1884_v56 = vpack.c.bf16 %v5669_v34, %v5669_v34 }
 0x298   : > { %4543 = vmatmul.mubr.msk.bf16.vlgmr.msra.gmra.mrb[16].mxu0 %vm607_vm1, %v1681_v25 }
 0x299   : > { %4546 = vmatprep.mubr.msk.bf16.mxu0 %vm607_vm1, %v1682_v31  ;;  %4551 = vmatpush3.bf16.msra.mxu0 %v1900_v46 }
 0x29a   : > { %4826 = vmatprep.subr.msk.bf16.mxu0 %vm620_vm0, %v3898_v63  ;;  %v5052_v63 = vmov 0   ;;  %vm3182_vm0 = vcmask 130048  }
 0x2a0   : > { %4547 = vmatmul.mubr.msk.bf16.gmra.mrb[60].mxu0 %vm607_vm1, %v1683_v49  ;;  %v2226_v49 = vsel %vm2224_vm10, 65535, %v5052_v63 }
 0x2a1   : > { %4552 = vmatprep.mubr.msk.bf16.mxu0 %vm607_vm1, %v1881_v55 }
 0x2a8   : > { %4553 = vmatmul.mubr.msk.bf16.vlgmr.msra.gmra.mrb[16].mxu0 %vm607_vm1, %v1882_v0 }
 0x2a9   : > { %4556 = vmatprep.mubr.msk.bf16.mxu0 %vm607_vm1, %v1883_v27  ;;  %4561 = vmatpush3.bf16.msra.mxu0 %v2101_v14 }
 0x2aa   : > { %4570 = vmatprep.subr.bf16.mxu0 %v5050_v23 }
 0x2b0   : > { %4557 = vmatmul.mubr.msk.bf16.gmra.mrb[64].mxu0 %vm607_vm1, %v1884_v56  ;;  %v4968_v56 = vld [vmem:[%s6090_s4 + $0x8] sm:$0x1f]  }
 0x2b1   : > { %4562 = vmatprep.mubr.msk.bf16.mxu0 %vm607_vm1, %v2082_v37 }
 0x2b8   : > { %4563 = vmatmul.mubr.msk.bf16.vlgmr.msra.gmra.mrb[16].mxu0 %vm607_vm1, %v2083_v50 }
 0x2b9   : > { %4566 = vmatprep.mubr.msk.bf16.mxu0 %vm607_vm1, %v2084_v60 }
 0x2c0   : > { %4567 = vmatmul.mubr.msk.bf16.gmra.mrb[68].mxu0 %vm607_vm1, %v2085_v17  ;;  %v4969_v17 = vld [vmem:[%s6090_s4] sm:$0x1f]   ;;  %vm3655_vm1 = vcmask 253952  }
 0x2c1   : > { %4578 = vmatprep.mubr.msk.bf16.mxu0 %vm5051_vm2, %v5050_v23 }
 0x363   : > { %v4538_v25 = vpop.f32.mrb[56].mxu0 }
 0x364   : > { %v1570_v29 = vadd.f32 %v4538_v25, %v5691_v39  ;;  %v1550_v30 = vpop.f32.mrb[57].mxu0  ;;  %v3910_v25 = vld [vmem:[%s6091_s5 + $0x4] sm:$0xf] }
 0x365   : > { %v1568_v31 = vadd.f32 %v1550_v30, %v5693_v45  ;;  %v4539_v42 = vpop.f32.mrb[58].mxu0  ;;  %v2272_v30 = vld [vmem:[%s6091_s5] sm:$0xf] }
 0x366   : > { %v1553_v53 = vpop.f32.mrb[59].mxu0 }
 0x367   : > { %v1569_v54 = vadd.f32 %v1553_v53, %v5695_v18 }
 0x373   : > { %v4548_v55 = vpop.f32.mrb[60].mxu0 }
 0x374   : > { %v1771_v61 = vadd.f32 %v4548_v55, %v1570_v29  ;;  %v1751_v62 = vpop.f32.mrb[61].mxu0  ;;  %v2334_v29 = vsel %vm2332_vm12, %v3910_v25, 0 }
 0x375   : > { %v1769_v0 = vadd.f32 %v1751_v62, %v1568_v31  ;;  %v4549_v9 = vpop.f32.mrb[62].mxu0  ;;  %v2381_v31 = vsel %vm2332_vm12, %v2272_v30, 0  ;;  %v3935_v30 = vld [vmem:[%s6091_s5 + $0x14] sm:$0xf] }
 0x376   : > { %v1754_v21 = vpop.f32.mrb[63].mxu0 }
 0x377   : > { %v1770_v27 = vadd.f32 %v1754_v21, %v1569_v54 }
 0x383   : > { %v4558_v34 = vpop.f32.mrb[64].mxu0 }
 0x384   : > { %v1972_v19 = vadd.f32 %v4558_v34, %v1771_v61  ;;  %v1952_v35 = vpop.f32.mrb[65].mxu0  ;;  %v4970_v34 = vld [vmem:[%s6090_s4 + $0x10] sm:$0x1f]  }
 0x385   : > { %v1970_v37 = vadd.f32 %v1952_v35, %v1769_v0  ;;  %v4559_v43 = vpop.f32.mrb[66].mxu0 }
 0x386   : > { %v1955_v48 = vpop.f32.mrb[67].mxu0 }
 0x387   : > { %v1971_v50 = vadd.f32 %v1955_v48, %v1770_v27 }
 0x38b   : > { %v4564_v59 = vpop.f32.mrb[16].mxu0 }
 0x38c   : > { %v2183_v60 = vadd.f32 %v4564_v59, %v3903_v52  ;;  %v2137_v4 = vpop.f32.mrb[17].mxu0 }
 0x38d   : > { %v2181_v39 = vadd.f32 %v3903_v52, %v2137_v4  ;;  %v4565_v45 = vpop.f32.mrb[18].mxu0 }
 0x38e   : > { %v2197_v18 = vmul.f32 0.2, %v2183_v60  ;;  %v2184_v11 = vadd.f32 %v4565_v45, %v3903_v52  ;;  %v2140_v24 = vpop.f32.mrb[19].mxu0  ;;  %vm2190_vm3 = vcmp.gt.f32.partialorder %v2183_v60, 0.0 }
 0x38f   : > { %v2195_v26 = vmul.f32 0.2, %v2181_v39  ;;  %v2182_v32 = vadd.f32 %v3903_v52, %v2140_v24  ;;  %vm2188_vm4 = vcmp.gt.f32.partialorder %v2181_v39, 0.0 }
 0x390   : > { %vm2191_vm5 = vcmp.gt.f32.partialorder %v2184_v11, 0.0  ;;  %v2198_v1 = vmul.f32 0.2, %v2184_v11  ;;  %v2204_v20 = vsel %vm2190_vm3, %v2183_v60, %v2197_v18 }
 0x391   : > { %vm2189_vm6 = vcmp.gt.f32.partialorder %v2182_v32, 0.0  ;;  %v2196_v38 = vmul.f32 0.2, %v2182_v32  ;;  %v2202_v36 = vsel %vm2188_vm4, %v2181_v39, %v2195_v26 }
 0x392   : > { %v2205_v41 = vsel %vm2191_vm5, %v2184_v11, %v2198_v1  ;;  %v4971_v1 = vld [vmem:[%s6090_s4 + $0x18] sm:$0x1f]  }
 0x393   : > { %v5770_v44 = vpack.c.bf16 %v2205_v41, %v2204_v20  ;;  %v2203_v47 = vsel %vm2189_vm6, %v2182_v32, %v2196_v38  ;;  %v4568_v5 = vpop.f32.mrb[68].mxu0  ;;  %v3923_v38 = vld [vmem:[%s6091_s5 + $0xc] sm:$0xf] }
 0x394   : > { %v5772_v51 = vpack.c.bf16 %v2203_v47, %v2202_v36  ;;  %v2173_v57 = vadd.f32 %v4568_v5, %v1972_v19  ;;  %v2153_v58 = vpop.f32.mrb[69].mxu0  ;;  %v3917_v19 = vld [vmem:[%s6091_s5 + $0x8] sm:$0xf]  ;;  %v2587_v20 = vsel %vm2332_vm12, %v3923_v38, 0 }
 0x395   : > { %v2171_v2 = vadd.f32 %v2153_v58, %v1970_v37  ;;  %v4569_v3 = vpop.f32.mrb[70].mxu0  ;;  %v2483_v35 = vsel %vm2332_vm12, %v3917_v19, 0  ;;  %v4974_v19 = vld [vmem:[%s6090_s4 + $0x30] sm:$0x1f]  }
 0x396   : > { %v2187_v6 = vadd.f32 %v3903_v52, %v2173_v57  ;;  %v2156_v7 = vpop.f32.mrb[71].mxu0  ;;  %4571 = vmatpush3.bf16.msra.mxu0 %v5772_v51  ;;  %4583 = vmatpush3.bf16.msra.mxu1 %v5772_v51 }
 0x397   : > { %v2185_v10 = vadd.f32 %v3903_v52, %v2171_v2  ;;  %v2172_v12 = vadd.f32 %v2156_v7, %v1971_v50  ;;  %4572 = vmatprep.subr.bf16.mxu0 %v5050_v23  ;;  %4584 = vmatprep.subr.bf16.mxu1 %v5050_v23 }
 0x398   : > { %vm2194_vm7 = vcmp.gt.f32.partialorder %v2187_v6, 0.0  ;;  %v2201_v13 = vmul.f32 0.2, %v2187_v6 }
 0x399   : > { %v2199_v15 = vmul.f32 0.2, %v2185_v10  ;;  %v2186_v16 = vadd.f32 %v3903_v52, %v2172_v12  ;;  %vm2192_vm8 = vcmp.gt.f32.partialorder %v2185_v10, 0.0  ;;  %v4972_v12 = vld [vmem:[%s6090_s4 + $0x20] sm:$0x1f]  }
 0x39a   : > { %4573 = vmatpush3.bf16.msra.mxu0 %v5770_v44  ;;  %4585 = vmatpush3.bf16.msra.mxu1 %v5770_v44  ;;  %v2208_v8 = vsel %vm2194_vm7, %v2187_v6, %v2201_v13  ;;  %v3929_v13 = vld [vmem:[%s6091_s5 + $0x10] sm:$0xf] }
 0x39b   : > { %vm2193_vm9 = vcmp.gt.f32.partialorder %v2186_v16, 0.0  ;;  %v2200_v22 = vmul.f32 0.2, %v2186_v16  ;;  %4574 = vmatprep.subr.bf16.mxu0 %v5050_v23  ;;  %4586 = vmatprep.subr.bf16.mxu1 %v5050_v23  ;;  %v2206_v28 = vsel %vm2192_vm8, %v2185_v10, %v2199_v15  ;;  %v2212_v40 = vpack.c.bf16 %v2208_v8, %v2208_v8 }
 0x39c   : > { %v2691_v15 = vsel %vm2332_vm12, %v3929_v13, 0 }
 0x39d   : > { %v2207_v33 = vsel %vm2193_vm9, %v2186_v16, %v2200_v22  ;;  %v5788_v14 = vand.u32 %v2226_v49, %v2212_v40 }
 0x39e   : > { %v5782_v46 = vpack.c.bf16 %v2207_v33, %v2206_v28 }
 0x3a0   : > { %4575 = vmatpush3.bf16.msra.mxu0 %v5782_v46  ;;  %4587 = vmatpush3.bf16.msra.mxu1 %v5782_v46 }
 0x3a1   : > { %4576 = vmatprep.subr.bf16.mxu0 %v5050_v23  ;;  %4588 = vmatprep.subr.bf16.mxu1 %v5050_v23 }
 0x3a4   : > { %4577 = vmatpush3.bf16.msra.mxu0 %v5788_v14  ;;  %4589 = vmatpush3.bf16.msra.mxu1 %v5788_v14 }
 0x3a5   : > { %4594 = vmatprep.subr.bf16.mxu0 %v5050_v23  ;;  %4600 = vmatprep.subr.bf16.mxu1 %v5050_v23 }
 0x3a7   : > { %4591 = vmatmul.mubr.msk.bf16.vlgmr.msra.gmra.mrb[112].mxu1 %vm2220_vm11, %v4968_v56  ;;  %4579 = vmatmul.mubr.msk.bf16.vlgmr.msra.gmra.mrb[72].mxu0 %vm2220_vm11, %v4969_v17 }
 0x3a8   : > { %4596 = vmatprep.mubr.msk.bf16.mxu0 %vm5051_vm2, %v5050_v23  ;;  %4602 = vmatprep.mubr.msk.bf16.mxu1 %vm5051_vm2, %v5050_v23 }
 0x3a9   : > { %4595 = vmatpush3.bf16.msra.mxu0 %v2334_v29  ;;  %4601 = vmatpush3.bf16.msra.mxu1 %v2381_v31  ;;  %v4973_v29 = vld [vmem:[%s6090_s4 + $0x28] sm:$0x1f]   ;;  %v2795_v31 = vsel %vm2332_vm12, %v3935_v30, 0 }
 0x3aa   : > { %4606 = vmatprep.subr.bf16.mxu0 %v5050_v23  ;;  %4618 = vmatprep.subr.bf16.mxu1 %v5050_v23 }
 0x47a   : > { %v2318_v42 = vpop.f32.mrb[112].mxu1  ;;  %v2264_v53 = vpop.f32.mrb[72].mxu0 }
 0x47b   : > { %v4592_v54 = vpop.f32.mrb[113].mxu1  ;;  %v4580_v55 = vpop.f32.mrb[73].mxu0 }
 0x47c   : > { %v2321_v61 = vpop.f32.mrb[114].mxu1  ;;  %v2267_v62 = vpop.f32.mrb[74].mxu0 }
 0x47d   : > { %v2325_v0 = vpack.c.bf16 %v2321_v61, %v2318_v42  ;;  %v2271_v9 = vpack.c.bf16 %v2267_v62, %v2264_v53  ;;  %v4593_v21 = vpop.f32.mrb[115].mxu1  ;;  %v4581_v27 = vpop.f32.mrb[75].mxu0 }
 0x47f   : > { %4597 = vmatmul.mubr.msk.bf16.vlgmr.msra.gmra.mrb[76].mxu0 %vm2328_vm13, %v2325_v0  ;;  %4603 = vmatmul.mubr.msk.bf16.vlgmr.msra.gmra.mrb[116].mxu1 %vm2328_vm13, %v2271_v9 }
 0x480   : > { %4607 = vmatpush3.bf16.msra.mxu0 %v5772_v51  ;;  %4614 = vmatprep.mubr.msk.bf16.mxu0 %vm5051_vm2, %v5050_v23 }
 0x481   : > { %4608 = vmatprep.subr.bf16.mxu0 %v5050_v23  ;;  %4620 = vmatprep.mubr.msk.bf16.mxu1 %vm5051_vm2, %v5050_v23 }
 0x482   : > { %4619 = vmatpush3.bf16.msra.mxu1 %v2483_v35  ;;  %v3941_v35 = vld [vmem:[%s6091_s5 + $0x18] sm:$0xf] }
 0x483   : > { %4624 = vmatprep.subr.bf16.mxu1 %v5050_v23 }
 0x484   : > { %4609 = vmatpush3.bf16.msra.mxu0 %v5770_v44 }
 0x485   : > { %4610 = vmatprep.subr.bf16.mxu0 %v5050_v23 }
 0x488   : > { %4611 = vmatpush3.bf16.msra.mxu0 %v5782_v46 }
 0x489   : > { %4612 = vmatprep.subr.bf16.mxu0 %v5050_v23 }
 0x48c   : > { %4613 = vmatpush3.bf16.msra.mxu0 %v5788_v14 }
 0x48d   : > { %4636 = vmatprep.subr.bf16.mxu0 %v5050_v23 }
 0x48f   : > { %4615 = vmatmul.mubr.msk.bf16.vlgmr.msra.gmra.mrb[80].mxu0 %vm2220_vm11, %v4970_v34 }
 0x490   : > { %4638 = vmatprep.mubr.msk.bf16.mxu0 %vm5051_vm2, %v5050_v23  ;;  %4637 = vmatpush3.bf16.msra.mxu0 %v2587_v20 }
 0x491   : > { %4642 = vmatprep.subr.bf16.mxu0 %v5050_v23 }
 0x552   : > { %v2370_v37 = vpop.f32.mrb[76].mxu0  ;;  %v2417_v43 = vpop.f32.mrb[116].mxu1 }
 0x553   : > { %v4598_v48 = vpop.f32.mrb[77].mxu0  ;;  %v2418_v50 = vadd.f32 %v2417_v43, %v2370_v37  ;;  %v4604_v52 = vpop.f32.mrb[117].mxu1  ;;  %v2899_v37 = vsel %vm2332_vm12, %v3941_v35, 0 }
 0x554   : > { %v2373_v59 = vpop.f32.mrb[78].mxu0  ;;  %v2420_v60 = vpop.f32.mrb[118].mxu1 }
 0x555   : > { %v4599_v4 = vpop.f32.mrb[79].mxu0  ;;  %v2421_v39 = vadd.f32 %v2420_v60, %v2373_v59  ;;  %v4605_v45 = vpop.f32.mrb[119].mxu1 }
 0x562   : > { %v2469_v18 = vpop.f32.mrb[80].mxu0 }
 0x563   : > { %v4616_v11 = vpop.f32.mrb[81].mxu0 }
 0x564   : > { %v2472_v24 = vpop.f32.mrb[82].mxu0 }
 0x565   : > { %v2476_v26 = vpack.c.bf16 %v2472_v24, %v2469_v18  ;;  %v4617_v32 = vpop.f32.mrb[83].mxu0  ;;  %v4975_v24 = vld [vmem:[%s6090_s4 + $0x38] sm:$0x1f]  }
 0x567   : > { %4621 = vmatmul.mubr.msk.bf16.vlgmr.msra.gmra.mrb[120].mxu1 %vm2328_vm13, %v2476_v26  ;;  %v3947_v26 = vld [vmem:[%s6091_s5 + $0x1c] sm:$0xf] }
 0x568   : > { %4625 = vmatpush3.bf16.msra.mxu1 %v5772_v51  ;;  %4632 = vmatprep.mubr.msk.bf16.mxu1 %vm5051_vm2, %v5050_v23  ;;  %v3003_v32 = vsel %vm2332_vm12, %v3947_v26, 0 }
 0x569   : > { %4626 = vmatprep.subr.bf16.mxu1 %v5050_v23 }
 0x56c   : > { %4627 = vmatpush3.bf16.msra.mxu1 %v5770_v44 }
 0x56d   : > { %4628 = vmatprep.subr.bf16.mxu1 %v5050_v23 }
 0x570   : > { %4629 = vmatpush3.bf16.msra.mxu1 %v5782_v46 }
 0x571   : > { %4630 = vmatprep.subr.bf16.mxu1 %v5050_v23 }
 0x574   : > { %4631 = vmatpush3.bf16.msra.mxu1 %v5788_v14 }
 0x575   : > { %4654 = vmatprep.subr.bf16.mxu1 %v5050_v23 }
 0x577   : > { %4633 = vmatmul.mubr.msk.bf16.vlgmr.msra.gmra.mrb[124].mxu1 %vm2220_vm11, %v4971_v1 }
 0x578   : > { %4656 = vmatprep.mubr.msk.bf16.mxu1 %vm5051_vm2, %v5050_v23  ;;  %4655 = vmatpush3.bf16.msra.mxu1 %v2691_v15 }
 0x579   : > { %4660 = vmatprep.subr.bf16.mxu1 %v5050_v23 }
 0x63a   : > { %v2519_v41 = vpop.f32.mrb[120].mxu1 }
 0x63b   : > { %v2526_v36 = vadd.f32 %v2519_v41, %v2418_v50  ;;  %v4622_v47 = vpop.f32.mrb[121].mxu1 }
 0x63c   : > { %v2522_v5 = vpop.f32.mrb[122].mxu1 }
 0x63d   : > { %v2527_v57 = vadd.f32 %v2522_v5, %v2421_v39  ;;  %v4623_v58 = vpop.f32.mrb[123].mxu1 }
 0x64a   : > { %v2573_v2 = vpop.f32.mrb[124].mxu1 }
 0x64b   : > { %v4634_v3 = vpop.f32.mrb[125].mxu1 }
 0x64c   : > { %v2576_v6 = vpop.f32.mrb[126].mxu1 }
 0x64d   : > { %v2580_v7 = vpack.c.bf16 %v2576_v6, %v2573_v2  ;;  %v4635_v10 = vpop.f32.mrb[127].mxu1  ;;  %v4976_v6 = vld [vmem:[%s6090_s4 + $0x40] sm:$0x1f]  }
 0x64f   : > { %4639 = vmatmul.mubr.msk.bf16.vlgmr.msra.gmra.mrb[84].mxu0 %vm2328_vm13, %v2580_v7 }
 0x650   : > { %4643 = vmatpush3.bf16.msra.mxu0 %v5772_v51  ;;  %4650 = vmatprep.mubr.msk.bf16.mxu0 %vm5051_vm2, %v5050_v23 }
 0x651   : > { %4644 = vmatprep.subr.bf16.mxu0 %v5050_v23 }
 0x654   : > { %4645 = vmatpush3.bf16.msra.mxu0 %v5770_v44 }
 0x655   : > { %4646 = vmatprep.subr.bf16.mxu0 %v5050_v23 }
 0x658   : > { %4647 = vmatpush3.bf16.msra.mxu0 %v5782_v46 }
 0x659   : > { %4648 = vmatprep.subr.bf16.mxu0 %v5050_v23 }
 0x65c   : > { %4649 = vmatpush3.bf16.msra.mxu0 %v5788_v14 }
 0x65d   : > { %4672 = vmatprep.subr.bf16.mxu0 %v5050_v23 }
 0x65f   : > { %4651 = vmatmul.mubr.msk.bf16.vlgmr.msra.gmra.mrb[88].mxu0 %vm2220_vm11, %v4972_v12 }
 0x660   : > { %4674 = vmatprep.mubr.msk.bf16.mxu0 %vm5051_vm2, %v5050_v23  ;;  %4673 = vmatpush3.bf16.msra.mxu0 %v2795_v31 }
 0x661   : > { %4678 = vmatprep.subr.bf16.mxu0 %v5050_v23 }
 0x722   : > { %v2623_v16 = vpop.f32.mrb[84].mxu0 }
 0x723   : > { %v2630_v8 = vadd.f32 %v2623_v16, %v2526_v36  ;;  %v4640_v22 = vpop.f32.mrb[85].mxu0 }
 0x724   : > { %v2626_v28 = vpop.f32.mrb[86].mxu0 }
 0x725   : > { %v2631_v33 = vadd.f32 %v2626_v28, %v2527_v57  ;;  %v4641_v40 = vpop.f32.mrb[87].mxu0 }
 0x726   : > { %v4978_v40 = vld [vmem:[%s6093_s7 + $0x8] sm:$0xff]  }
 0x732   : > { %v2677_v63 = vpop.f32.mrb[88].mxu0 }
 0x733   : > { %v4652_v49 = vpop.f32.mrb[89].mxu0 }
 0x734   : > { %v2680_v56 = vpop.f32.mrb[90].mxu0  ;;  %v3955_v49 = vld [vmem:[%s6092_s6] ss:$0 sm:$0xff] }
 0x735   : > { %v2684_v17 = vpack.c.bf16 %v2680_v56, %v2677_v63  ;;  %v4653_v25 = vpop.f32.mrb[91].mxu0 }
 0x737   : > { %4657 = vmatmul.mubr.msk.bf16.vlgmr.msra.gmra.mrb[128].mxu1 %vm2328_vm13, %v2684_v17 }
 0x738   : > { %4661 = vmatpush3.bf16.msra.mxu1 %v5772_v51  ;;  %4668 = vmatprep.mubr.msk.bf16.mxu1 %vm5051_vm2, %v5050_v23 }
 0x739   : > { %4662 = vmatprep.subr.bf16.mxu1 %v5050_v23 }
 0x73c   : > { %4663 = vmatpush3.bf16.msra.mxu1 %v5770_v44 }
 0x73d   : > { %4664 = vmatprep.subr.bf16.mxu1 %v5050_v23 }
 0x740   : > { %4665 = vmatpush3.bf16.msra.mxu1 %v5782_v46 }
 0x741   : > { %4666 = vmatprep.subr.bf16.mxu1 %v5050_v23 }
 0x744   : > { %4667 = vmatpush3.bf16.msra.mxu1 %v5788_v14 }
 0x745   : > { %4690 = vmatprep.subr.bf16.mxu1 %v5050_v23 }
 0x747   : > { %4669 = vmatmul.mubr.msk.bf16.vlgmr.msra.gmra.mrb[132].mxu1 %vm2220_vm11, %v4973_v29 }
 0x748   : > { %4692 = vmatprep.mubr.msk.bf16.mxu1 %vm5051_vm2, %v5050_v23  ;;  %4691 = vmatpush3.bf16.msra.mxu1 %v2899_v37  ;;  %v4983_v37 = vld [vmem:[%s6093_s7 + $0x38] sm:$0xff]  }
 0x749   : > { %4696 = vmatprep.subr.bf16.mxu1 %v5050_v23 }
 0x80a   : > { %v2727_v42 = vpop.f32.mrb[128].mxu1 }
 0x80b   : > { %v2734_v53 = vadd.f32 %v2727_v42, %v2630_v8  ;;  %v4658_v54 = vpop.f32.mrb[129].mxu1 }
 0x80c   : > { %v2730_v55 = vpop.f32.mrb[130].mxu1 }
 0x80d   : > { %v2735_v61 = vadd.f32 %v2730_v55, %v2631_v33  ;;  %v4659_v62 = vpop.f32.mrb[131].mxu1  ;;  %v4977_v33 = vld [vmem:[%s6093_s7] sm:$0xff]  }
 0x80e   : > { %v4979_v62 = vld [vmem:[%s6093_s7 + $0x18] sm:$0xff]  }
 0x81a   : > { %v2781_v0 = vpop.f32.mrb[132].mxu1 }
 0x81b   : > { %v4670_v9 = vpop.f32.mrb[133].mxu1 }
 0x81c   : > { %v2784_v21 = vpop.f32.mrb[134].mxu1  ;;  %v4980_v9 = vld [vmem:[%s6093_s7 + $0x10] sm:$0xff]  }
 0x81d   : > { %v2788_v27 = vpack.c.bf16 %v2784_v21, %v2781_v0  ;;  %v4671_v34 = vpop.f32.mrb[135].mxu1 }
 0x81f   : > { %4675 = vmatmul.mubr.msk.bf16.vlgmr.msra.gmra.mrb[92].mxu0 %vm2328_vm13, %v2788_v27  ;;  %v4981_v27 = vld [vmem:[%s6093_s7 + $0x28] sm:$0xff]  }
 0x820   : > { %4679 = vmatpush3.bf16.msra.mxu0 %v5772_v51  ;;  %4686 = vmatprep.mubr.msk.bf16.mxu0 %vm5051_vm2, %v5050_v23 }
 0x821   : > { %4680 = vmatprep.subr.bf16.mxu0 %v5050_v23 }
 0x824   : > { %4681 = vmatpush3.bf16.msra.mxu0 %v5770_v44 }
 0x825   : > { %4682 = vmatprep.subr.bf16.mxu0 %v5050_v23 }
 0x828   : > { %4683 = vmatpush3.bf16.msra.mxu0 %v5782_v46 }
 0x829   : > { %4684 = vmatprep.subr.bf16.mxu0 %v5050_v23 }
 0x82c   : > { %4685 = vmatpush3.bf16.msra.mxu0 %v5788_v14 }
 0x82d   : > { %4708 = vmatprep.subr.bf16.mxu0 %v5050_v23 }
 0x82f   : > { %4687 = vmatmul.mubr.msk.bf16.vlgmr.msra.gmra.mrb[96].mxu0 %vm2220_vm11, %v4974_v19  ;;  %v4982_v19 = vld [vmem:[%s6093_s7 + $0x20] sm:$0xff]  }
 0x830   : > { %4710 = vmatprep.mubr.msk.bf16.mxu0 %vm5051_vm2, %v5050_v23  ;;  %4709 = vmatpush3.bf16.msra.mxu0 %v3003_v32 }
 0x831   : > { %4714 = vmatprep.subr.bf16.mxu0 %v5050_v23 }
 0x8f2   : > { %v2831_v43 = vpop.f32.mrb[92].mxu0 }
 0x8f3   : > { %v2838_v48 = vadd.f32 %v2831_v43, %v2734_v53  ;;  %v4676_v50 = vpop.f32.mrb[93].mxu0 }
 0x8f4   : > { %v2834_v52 = vpop.f32.mrb[94].mxu0 }
 0x8f5   : > { %v2839_v59 = vadd.f32 %v2834_v52, %v2735_v61  ;;  %v4677_v60 = vpop.f32.mrb[95].mxu0 }
 0x902   : > { %v2885_v4 = vpop.f32.mrb[96].mxu0 }
 0x903   : > { %v4688_v39 = vpop.f32.mrb[97].mxu0 }
 0x904   : > { %v2888_v45 = vpop.f32.mrb[98].mxu0 }
 0x905   : > { %v2892_v18 = vpack.c.bf16 %v2888_v45, %v2885_v4  ;;  %v4689_v11 = vpop.f32.mrb[99].mxu0 }
 0x907   : > { %4693 = vmatmul.mubr.msk.bf16.vlgmr.msra.gmra.mrb[136].mxu1 %vm2328_vm13, %v2892_v18 }
 0x908   : > { %4697 = vmatpush3.bf16.msra.mxu1 %v5772_v51  ;;  %4704 = vmatprep.mubr.msk.bf16.mxu1 %vm5051_vm2, %v5050_v23 }
 0x909   : > { %4698 = vmatprep.subr.bf16.mxu1 %v5050_v23 }
 0x90c   : > { %4699 = vmatpush3.bf16.msra.mxu1 %v5770_v44 }
 0x90d   : > { %4700 = vmatprep.subr.bf16.mxu1 %v5050_v23 }
 0x910   : > { %4701 = vmatpush3.bf16.msra.mxu1 %v5782_v46 }
 0x911   : > { %4702 = vmatprep.subr.bf16.mxu1 %v5050_v23 }
 0x914   : > { %4703 = vmatpush3.bf16.msra.mxu1 %v5788_v14 }
 0x915   : > { %4726 = vmatprep.subr.bf16.mxu1 %v5050_v23 }
 0x917   : > { %4705 = vmatmul.mubr.msk.bf16.vlgmr.msra.gmra.mrb[140].mxu1 %vm2220_vm11, %v4975_v24 }
 0x918   : > { %4728 = vmatprep.mubr.msk.bf16.mxu1 %vm5051_vm2, %v5050_v23 }
 0x9da   : > { %v2935_v1 = vpop.f32.mrb[136].mxu1 }
 0x9db   : > { %v2942_v38 = vadd.f32 %v2935_v1, %v2838_v48  ;;  %v4694_v20 = vpop.f32.mrb[137].mxu1  ;;  %v4984_v48 = vld [vmem:[%s6093_s7 + $0x30] sm:$0xff]  }
 0x9dc   : > { %v2938_v41 = vpop.f32.mrb[138].mxu1 }
 0x9dd   : > { %v2943_v36 = vadd.f32 %v2938_v41, %v2839_v59  ;;  %v4695_v47 = vpop.f32.mrb[139].mxu1  ;;  %v4985_v59 = vld [vmem:[%s6093_s7 + $0x40] sm:$0xff]  }
 0x9ea   : > { %v2989_v5 = vpop.f32.mrb[140].mxu1 }
 0x9eb   : > { %v4706_v57 = vpop.f32.mrb[141].mxu1 }
 0x9ec   : > { %v2992_v58 = vpop.f32.mrb[142].mxu1 }
 0x9ed   : > { %v2996_v2 = vpack.c.bf16 %v2992_v58, %v2989_v5  ;;  %v4707_v3 = vpop.f32.mrb[143].mxu1 }
 0x9ef   : > { %4711 = vmatmul.mubr.msk.bf16.vlgmr.msra.gmra.mrb[100].mxu0 %vm2328_vm13, %v2996_v2 }
 0x9f0   : > { %4715 = vmatpush3.bf16.msra.mxu0 %v5772_v51  ;;  %4722 = vmatprep.mubr.msk.bf16.mxu0 %vm5051_vm2, %v5050_v23 }
 0x9f1   : > { %4716 = vmatprep.subr.bf16.mxu0 %v5050_v23 }
 0x9f4   : > { %4717 = vmatpush3.bf16.msra.mxu0 %v5770_v44  ;;  %v3953_v44 = vld [vmem:[%s6091_s5 + $0x20] sm:$0xf] }
 0x9f5   : > { %4718 = vmatprep.subr.bf16.mxu0 %v5050_v23  ;;  %v3107_v51 = vsel %vm2332_vm12, %v3953_v44, 0 }
 0x9f6   : > { %4727 = vmatpush3.bf16.msra.mxu1 %v3107_v51 }
 0x9f7   : > { %4732 = vmatprep.subr.bf16.mxu1 %v5050_v23 }
 0x9f8   : > { %4719 = vmatpush3.bf16.msra.mxu0 %v5782_v46 }
 0x9f9   : > { %4720 = vmatprep.subr.bf16.mxu0 %v5050_v23 }
 0x9fc   : > { %4721 = vmatpush3.bf16.msra.mxu0 %v5788_v14 }
 0x9fd   : > { %4738 = vmatprep.subr.bf16.mxu0 %v5050_v23 }
 0x9ff   : > { %4723 = vmatmul.mubr.msk.bf16.vlgmr.msra.gmra.mrb[104].mxu0 %vm2220_vm11, %v4976_v6 }
 0xa00   : > { %4740 = vmatprep.mubr.msk.bf16.mxu0 %vm5051_vm2, %v5050_v23  ;;  %4739 = vmatpush3.bf16.msra.mxu0 %v4977_v33 }
 0xa01   : > { %4750 = vmatprep.subr.bf16.mxu0 %v5050_v23 }
 0xac2   : > { %v3039_v46 = vpop.f32.mrb[100].mxu0 }
 0xac3   : > { %v3046_v7 = vadd.f32 %v3039_v46, %v2942_v38  ;;  %v4712_v10 = vpop.f32.mrb[101].mxu0 }
 0xac4   : > { %v3042_v14 = vpop.f32.mrb[102].mxu0 }
 0xac5   : > { %v3047_v12 = vadd.f32 %v3042_v14, %v2943_v36  ;;  %v4713_v13 = vpop.f32.mrb[103].mxu0 }
 0xad2   : > { %v3093_v15 = vpop.f32.mrb[104].mxu0 }
 0xad3   : > { %v4724_v16 = vpop.f32.mrb[105].mxu0 }
 0xad4   : > { %v3096_v8 = vpop.f32.mrb[106].mxu0 }
 0xad5   : > { %v3100_v22 = vpack.c.bf16 %v3096_v8, %v3093_v15  ;;  %v4725_v28 = vpop.f32.mrb[107].mxu0 }
 0xad7   : > { %4729 = vmatmul.mubr.msk.bf16.vlgmr.msra.gmra.mrb[144].mxu1 %vm2328_vm13, %v3100_v22 }
 0xad8   : > { %4734 = vmatprep.mubr.msk.bf16.mxu1 %vm5051_vm2, %v5050_v23  ;;  %4733 = vmatpush3.bf16.msra.mxu1 %v4978_v40 }
 0xad9   : > { %4744 = vmatprep.subr.bf16.mxu1 %v5050_v23 }
 0xbaa   : > { %v3143_v63 = vpop.f32.mrb[144].mxu1 }
 0xbab   : > { %v3150_v56 = vadd.f32 %v3143_v63, %v3046_v7  ;;  %v4730_v17 = vpop.f32.mrb[145].mxu1 }
 0xbac   : > { %v3146_v25 = vpop.f32.mrb[146].mxu1 }
 0xbad   : > { %v3159_v29 = vadd.f32 %v3955_v49, %v3150_v56  ;;  %v3151_v30 = vadd.f32 %v3146_v25, %v3047_v12  ;;  %v4731_v31 = vpop.f32.mrb[147].mxu1 }
 0xbaf   : > { %v3163_v42 = vmul.f32 0.2, %v3159_v29  ;;  %v3160_v53 = vadd.f32 %v3955_v49, %v3151_v30  ;;  %vm3161_vm14 = vcmp.gt.f32.partialorder %v3159_v29, 0.0 }
 0xbb1   : > { %vm3162_vm15 = vcmp.gt.f32.partialorder %v3160_v53, 0.0  ;;  %v3164_v54 = vmul.f32 0.2, %v3160_v53  ;;  %v3165_v55 = vsel %vm3161_vm14, %v3159_v29, %v3163_v42  ;;  %v3653_v29 = vld [vmem:[%s6094_s8] sm:$0x1] }
 0xbb3   : > { %v3166_v61 = vsel %vm3162_vm15, %v3160_v53, %v3164_v54 }
 0xbb4   : > { %v3167_v0 = vpack.c.bf16 %v3166_v61, %v3165_v55 }
 0xbb6   : > { %4741 = vmatmul.mubr.msk.bf16.vlgmr.msra.gmra.mrb[108].mxu0 %vm3182_vm0, %v3167_v0  ;;  %v3174_v21 = vshrl.u32 %v3167_v0, 16  ;;  %v3278_v35 = vrot.slane %v3167_v0, 1  ;;  %v3386_v50 = vrot.slane %v3167_v0, 2  ;;  %v3494_v60 = vrot.slane %v3167_v0, 3 }
 0xbb7   : > { %4751 = vmatpush3.bf16.msra.mxu0 %v4979_v62  ;;  %4752 = vmatprep.mubr.msk.bf16.mxu0 %vm5051_vm2, %v5050_v23  ;;  %v3602_v4 = vrot.slane %v3167_v0, 4 }
 0xbb8   : > { %4735 = vmatmul.mubr.msk.bf16.vlgmr.msra.gmra.mrb[148].mxu1 %vm3182_vm0, %v3174_v21  ;;  %4762 = vmatprep.subr.bf16.mxu0 %v5050_v23  ;;  %v3332_v34 = vrot.slane %v3174_v21, 1  ;;  %v3440_v43 = vrot.slane %v3174_v21, 2  ;;  %v3548_v52 = vrot.slane %v3174_v21, 3 }
 0xbb9   : > { %4745 = vmatpush3.bf16.msra.mxu1 %v4980_v9  ;;  %4746 = vmatprep.mubr.msk.bf16.mxu1 %vm5051_vm2, %v5050_v23 }
 0xbba   : > { %4756 = vmatprep.subr.bf16.mxu1 %v5050_v23 }
 0xbbe   : > { %4753 = vmatmul.mubr.msk.bf16.vlgmr.msra.gmra.mrb[112].mxu0 %vm3182_vm0, %v3332_v34 }
 0xbbf   : > { %4763 = vmatpush3.bf16.msra.mxu0 %v4981_v27  ;;  %4764 = vmatprep.mubr.msk.bf16.mxu0 %vm5051_vm2, %v5050_v23 }
 0xbc0   : > { %4747 = vmatmul.mubr.msk.bf16.vlgmr.msra.gmra.mrb[152].mxu1 %vm3182_vm0, %v3278_v35  ;;  %4774 = vmatprep.subr.bf16.mxu0 %v5050_v23 }
 0xbc1   : > { %4757 = vmatpush3.bf16.msra.mxu1 %v4982_v19  ;;  %4758 = vmatprep.mubr.msk.bf16.mxu1 %vm5051_vm2, %v5050_v23 }
 0xbc2   : > { %4768 = vmatprep.subr.bf16.mxu1 %v5050_v23 }
 0xbc6   : > { %4765 = vmatmul.mubr.msk.bf16.vlgmr.msra.gmra.mrb[116].mxu0 %vm3182_vm0, %v3440_v43 }
 0xbc7   : > { %4775 = vmatpush3.bf16.msra.mxu0 %v4983_v37  ;;  %4776 = vmatprep.mubr.msk.bf16.mxu0 %vm5051_vm2, %v5050_v23 }
 0xbc8   : > { %4759 = vmatmul.mubr.msk.bf16.vlgmr.msra.gmra.mrb[156].mxu1 %vm3182_vm0, %v3386_v50 }
 0xbc9   : > { %4769 = vmatpush3.bf16.msra.mxu1 %v4984_v48  ;;  %4770 = vmatprep.mubr.msk.bf16.mxu1 %vm5051_vm2, %v5050_v23 }
 0xbca   : > { %4780 = vmatprep.subr.bf16.mxu1 %v5050_v23 }
 0xbce   : > { %4777 = vmatmul.mubr.msk.bf16.vlgmr.msra.gmra.mrb[120].mxu0 %vm3182_vm0, %v3548_v52 }
 0xbd0   : > { %4771 = vmatmul.mubr.msk.bf16.vlgmr.msra.gmra.mrb[160].mxu1 %vm3182_vm0, %v3494_v60 }
 0xbd1   : > { %4781 = vmatpush3.bf16.msra.mxu1 %v4985_v59  ;;  %4782 = vmatprep.mubr.msk.bf16.mxu1 %vm5051_vm2, %v5050_v23 }
 0xbd8   : > { %4783 = vmatmul.mubr.msk.bf16.vlgmr.msra.gmra.mrb[164].mxu1 %vm3182_vm0, %v3602_v4 }
 0xc89   : > { %v3268_v39 = vpop.f32.mrb[108].mxu0 }
 0xc8a   : > { %v4742_v45 = vpop.f32.mrb[109].mxu0 }
 0xc8b   : > { %v3220_v18 = vpop.f32.mrb[148].mxu1  ;;  %v3271_v11 = vpop.f32.mrb[110].mxu0 }
 0xc8c   : > { %v3269_v24 = vadd.f32 %v3268_v39, %v3220_v18  ;;  %v4736_v26 = vpop.f32.mrb[149].mxu1  ;;  %v4743_v32 = vpop.f32.mrb[111].mxu0 }
 0xc8d   : > { %v3223_v1 = vpop.f32.mrb[150].mxu1 }
 0xc8e   : > { %v4737_v38 = vpop.f32.mrb[151].mxu1 }
 0xc91   : > { %v3376_v20 = vpop.f32.mrb[112].mxu0 }
 0xc92   : > { %v4754_v41 = vpop.f32.mrb[113].mxu0 }
 0xc93   : > { %v3322_v36 = vpop.f32.mrb[152].mxu1  ;;  %v3379_v47 = vpop.f32.mrb[114].mxu0 }
 0xc94   : > { %v3328_v5 = vadd.f32 %v3322_v36, %v3269_v24  ;;  %v4748_v57 = vpop.f32.mrb[153].mxu1  ;;  %v4755_v58 = vpop.f32.mrb[115].mxu0 }
 0xc95   : > { %v3325_v23 = vpop.f32.mrb[154].mxu1 }
 0xc96   : > { %v4749_v2 = vpop.f32.mrb[155].mxu1  ;;  %v3382_v3 = vadd.f32 %v3376_v20, %v3328_v5 }
 0xc99   : > { %v3484_v6 = vpop.f32.mrb[116].mxu0 }
 0xc9a   : > { %v4766_v44 = vpop.f32.mrb[117].mxu0 }
 0xc9b   : > { %v3430_v51 = vpop.f32.mrb[156].mxu1  ;;  %v3487_v46 = vpop.f32.mrb[118].mxu0 }
 0xc9c   : > { %v3436_v7 = vadd.f32 %v3430_v51, %v3382_v3  ;;  %v4760_v10 = vpop.f32.mrb[157].mxu1  ;;  %v4767_v14 = vpop.f32.mrb[119].mxu0 }
 0xc9d   : > { %v3433_v12 = vpop.f32.mrb[158].mxu1 }
 0xc9e   : > { %v4761_v13 = vpop.f32.mrb[159].mxu1  ;;  %v3490_v15 = vadd.f32 %v3484_v6, %v3436_v7 }
 0xca1   : > { %v3592_v16 = vpop.f32.mrb[120].mxu0 }
 0xca2   : > { %v4778_v8 = vpop.f32.mrb[121].mxu0 }
 0xca3   : > { %v3538_v22 = vpop.f32.mrb[160].mxu1  ;;  %v3595_v28 = vpop.f32.mrb[122].mxu0 }
 0xca4   : > { %v3544_v33 = vadd.f32 %v3538_v22, %v3490_v15  ;;  %v4772_v40 = vpop.f32.mrb[161].mxu1  ;;  %v4779_v63 = vpop.f32.mrb[123].mxu0 }
 0xca5   : > { %v3541_v49 = vpop.f32.mrb[162].mxu1 }
 0xca6   : > { %v4773_v56 = vpop.f32.mrb[163].mxu1  ;;  %v3598_v17 = vadd.f32 %v3592_v16, %v3544_v33 }
 0xcab   : > { %v3646_v25 = vpop.f32.mrb[164].mxu1 }
 0xcac   : > { %v3652_v30 = vadd.f32 %v3646_v25, %v3598_v17  ;;  %v4784_v31 = vpop.f32.mrb[165].mxu1 }
 0xcad   : > { %v3649_v42 = vpop.f32.mrb[166].mxu1 }
 0xcae   : > { %v3654_v53 = vadd.f32 %v3653_v29, %v3652_v30  ;;  %v4785_v54 = vpop.f32.mrb[167].mxu1 }
 0xcb0   : > { %3656 = vst.msk [vmem:[%s324_s28] sm:$0x1] %vm3655_vm1, %v3654_v53 }
 0xcb1   : > { %4999 = shalt.err (!%p4996_p3)
}
 0xcb2   : > { %s5000_s24 = scalar_lea.hbm %s6044_s17, 16  ;;  %s5004_s28 = scalar_lea.hbm %s6095_s9, 32 }
 0xcb3   : > { %p5001_p4 = scmp.ne.s32.totalorder %s6044_s17, %s5000_s24  ;;  %p5005_p9 = scmp.lt.u32.totalorder %s6044_s17, %s6095_s9 }
 0xcb4   : > { %p5006_p10 = scmp.lt.u32.totalorder %s5004_s28, %s5000_s24  ;;  %p5008_p12 = scmp.lt.u32.totalorder %s5000_s24, %s6044_s17 }
 0xcb5   : > { %p5002_p7 = pnand %p5001_p4, %p5142_p5 }
 0xcb6   : > { %p5007_p11 = por %p5006_p10, %p5005_p9 }
 0xcb7   : > { %p5003_p8 = pneg %p5002_p7 }
 0xcb8   : > { %p5009_p13 = por %p5008_p12, %p5007_p11 }
 0xcba   : > { %p5010_p0 = pnand %p5009_p13, %p5003_p8 }
 0xcbc   : > { %5013 = shalt.err (!%p5010_p0)
}
 0xcbd   : > { %4827 = dma.vmem_to_hbm [thread:$0]  (%p5142_p5), %s6046_s29, 16, %s6044_s17, %s3658_s13  }
 0xcbe PF: > { %p4833_p1 = scmp.ge.s32.totalorder %s5048_s12, 2  ;;  %s3682_s21 = sand.u32 1, %s5036_s30  }
 0xcbf   : > { %s3683_s22 = scalar_lea.sflag [#allocation3], %s3682_s21 }
 0xcc0   : > { %p4830_p2 = pnand %p4833_p1, %p5146_p6 }
 0xcc2   : > { %5031 = dma.done.wait (!%p4830_p2), %s3683_s22, 16  }
 0xcc3   : > { %5033 = vsyncadd (!%p4830_p2), %s3683_s22, 4294967280  ;;  %p19_p3 = scmp.ge.s32.totalorder %s5129_s15, 4   ;;  %s6098_s30 = smov %s5040_s10 }
 0xcc4   : > { %s6099_s10 = smov %s5044_s11  ;;  %s6100_s11 = smov %s5140_s18 }
 0xcc5   : > { %s6101_s12 = smov %s5129_s15  ;;  %21 = sbr.rel (!%p19_p3) target bundleno = 3 (0x3), region = 131 }
 0xccc   :  { %3687 = vsyncpa [#allocation3], 1 }
 0xccd   :  { %3689 = vsyncpa [#allocation3 + $0x1], 1 }

</bundles_post_ra>
